<compile_context>
chip_gen: v7x
topology: tpu7x:2x2x1
jax: 0.10.0
libtpu: 0.0.40
codegen_flags: <defaults>
</compile_context>

<pallas_src>
import functools

import jax
import jax.numpy as jnp
from jax.experimental import pallas as pl
from jax.experimental.pallas import tpu as pltpu


def _round_up(x, m):
    return (x + m - 1) // m * m


# ---------------------------------------------------------------------------
# Fused kernel: per batch element, all V views live on the lane axis.
# Activations are (channels, N) with N = V * E lanes (E = padded, 128-aligned
# per-view pixel count); everything (VAE enc/dec, backbone, GAP, view mean,
# linear head) stays in VMEM.
# ---------------------------------------------------------------------------
def _recon_train_kernel(x_ref, mask_ref, w1_ref, w2_ref, w3_ref, hw_ref, hb_ref,
                        out_ref, halo_ref, stack_ref, *, taps, halo, inv_norm):
    n = x_ref.shape[-1]                       # lanes = V * E
    mask = mask_ref[...]                      # (1, n) f32, 1 at valid pixels
    # 8-row "bias block": row 0 = ones, rows 1..7 = zeros (keeps the stacked
    # operand an exact multiple of the (8,128) f32 tile).
    bias_rows = (jax.lax.broadcasted_iota(jnp.int32, (8, n), 0) == 0
                 ).astype(jnp.float32)
    # Zero the halo buffer once per grid step so shifted reads near the chunk
    # ends see zeros (those outputs are masked anyway, but must stay finite).
    halo_ref[...] = jnp.zeros_like(halo_ref)

    def conv3x3(x, w_ref, act):
        # x: (cin, n) f32, zeros at padding/tail.  w_ref: (cout, 9*cin+8) bf16.
        cin = x.shape[0]
        # Center the activation inside the zero halo (lane-aligned store).
        halo_ref[pl.ds(0, cin), pl.ds(halo, n)] = x
        # Build the stacked operand: 9 shifted copies + bias block.  All row
        # offsets are multiples of 8 -> tile-aligned f32 stores.
        for k, off in enumerate(taps):
            stack_ref[pl.ds(k * cin, cin), :] = (
                halo_ref[pl.ds(0, cin), pl.ds(halo + off, n)])
            # static slice: stack[k*cin + c, g] = x[c, g + off] (0 in the halo)
        stack_ref[pl.ds(9 * cin, 8), :] = bias_rows
        kk = 9 * cin + 8
        stacked = stack_ref[pl.ds(0, kk), :].astype(jnp.bfloat16)  # 1 cast/layer
        acc = jnp.dot(w_ref[...], stacked,
                      preferred_element_type=jnp.float32)          # one MXU dot
        acc = jnp.maximum(acc, 0.0) if act == "relu" else jax.nn.sigmoid(acc)
        # Re-zero padding/tail so the next conv sees proper zero padding and
        # the pooling reduction only counts valid pixels (f32 VPU).
        return acc * mask

    x = x_ref[...].astype(jnp.float32)            # (Cp, n), bf16 in HBM
    z = conv3x3(x, w1_ref, "relu")                # frozen VAE encoder  Cp -> Lp
    r = conv3x3(z, w2_ref, "sigmoid")             # frozen VAE recon    Lp -> Cp
    f = conv3x3(r, w3_ref, "relu")                # backbone conv       Cp -> F

    # Global average pool over valid pixels + mean over views: one lane sum.
    pooled = jnp.sum(f, axis=1, keepdims=True) * inv_norm          # (F, 1)
    # Fused linear head (tiny): broadcast-mul + sublane reduce, f32 all the way.
    logits = jnp.sum(pooled * hw_ref[...], axis=0, keepdims=True) + hb_ref[...]
    out_ref[...] = logits                                          # (1, NCLS)


# ---------------------------------------------------------------------------
# Deterministic synthetic parameters (no checkpoint loading).
# Conv weights are stored tap-major: (9, Cout, Cin), taps ordered (dh, dw).
# ---------------------------------------------------------------------------
def init_params(C=4, latent=8, feat=16, num_classes=8):
    k = jax.random.split(jax.random.PRNGKey(0), 4)
    s = 0.1
    return {
        # frozen VAE
        "vae_enc_w": s * jax.random.normal(k[0], (9, latent, C), jnp.float32),
        "vae_enc_b": jnp.zeros((latent,), jnp.float32),
        "vae_dec_w": s * jax.random.normal(k[1], (9, C, latent), jnp.float32),
        "vae_dec_b": jnp.zeros((C,), jnp.float32),
        # trainable model
        "bk_w": s * jax.random.normal(k[2], (9, feat, C), jnp.float32),
        "bk_b": jnp.zeros((feat,), jnp.float32),
        "head_w": s * jax.random.normal(k[3], (feat, num_classes), jnp.float32),
        "head_b": jnp.zeros((num_classes,), jnp.float32),
    }


# ---------------------------------------------------------------------------
# ReconTrain.forward(img, mode='train')
# ---------------------------------------------------------------------------
@jax.jit
def recon_train_forward(params, img):
    assert img.ndim == 5, f"Input must have 5 dims, got: {img.ndim}"
    B, V, C, H, W = img.shape
    L = params["vae_enc_w"].shape[1]
    F = params["bk_w"].shape[1]
    NCLS = params["head_w"].shape[1]

    Hp, Wp = H + 2, W + 2                    # 1-pixel zero-padding ring
    P = Hp * Wp                              # padded pixels per view
    E = _round_up(P, 128)                    # lane-aligned per-view chunk
    N = V * E                                # views folded into the lane axis
    Cp, Lp = _round_up(C, 8), _round_up(L, 8)   # tile-aligned channel counts
    HALO = 128                               # lane-aligned shift halo

    # 3x3 tap offsets in the flattened padded layout (static).
    taps = tuple((dh - 1) * Wp + (dw - 1) for dh in range(3) for dw in range(3))
    max_off = Wp + 1
    # Shift safety (static): interior outputs only ever read inside their own
    # view chunk, so cross-view / halo bleed only hits masked positions.
    assert E % 128 == 0 and E >= P
    assert HALO >= max_off
    assert (Wp + 1) - max_off >= 0           # first interior index - max |tap|
    assert (H * Wp + W) + max_off < P        # last interior index + max |tap|

    # --- layout prep (single cheap XLA pass): pad spatially + channel-pad,
    #     flatten, fold views into the lane axis, ship bf16 to HBM.
    xp = jnp.pad(img, ((0, 0), (0, 0), (0, Cp - C), (1, 1), (1, 1)))
    x = jnp.pad(xp.reshape(B, V, Cp, P), ((0, 0), (0, 0), (0, 0), (0, E - P)))
    x = jnp.transpose(x, (0, 2, 1, 3)).reshape(B, Cp, N).astype(jnp.bfloat16)

    interior = jnp.zeros((Hp, Wp), jnp.float32).at[1:H + 1, 1:W + 1].set(1.0)
    mask_e = jnp.zeros((E,), jnp.float32).at[:P].set(interior.reshape(P))
    mask = jnp.tile(mask_e, (V,)).reshape(1, N)

    inv_norm = 1.0 / float(V * H * W)        # GAP + mean-over-views in one go

    def fold(w, b, cin_pad, cout_pad):
        # (9, Cout, Cin) tap-major conv weight + (Cout,) bias ->
        # (cout_pad, 9*cin_pad + 8) bf16 matmul weight with the bias folded
        # into the last 8-column block (column 0 = bias, rest zero).
        t, co, ci = w.shape
        wp = jnp.pad(w, ((0, 0), (0, cout_pad - co), (0, cin_pad - ci)))
        wf = jnp.transpose(wp, (1, 0, 2)).reshape(cout_pad, t * cin_pad)
        bb = jnp.pad(jnp.pad(b, (0, cout_pad - co))[:, None], ((0, 0), (0, 7)))
        return jnp.concatenate([wf, bb], axis=1).astype(jnp.bfloat16)

    w1 = fold(params["vae_enc_w"], params["vae_enc_b"], Cp, Lp)   # (Lp, 9Cp+8)
    w2 = fold(params["vae_dec_w"], params["vae_dec_b"], Lp, Cp)   # (Cp, 9Lp+8)
    w3 = fold(params["bk_w"], params["bk_b"], Cp, F)              # (F,  9Cp+8)
    hw = params["head_w"].astype(jnp.float32)                     # (F, NCLS)
    hb = params["head_b"].reshape(1, NCLS).astype(jnp.float32)

    k1, k2, k3 = 9 * Cp + 8, 9 * Lp + 8, 9 * Cp + 8
    rows_h = max(Cp, Lp)
    stack_rows = max(k1, k2, k3)

    flops = 2 * B * N * (k1 * Lp + k2 * Cp + k3 * F) + 2 * B * F * NCLS
    bytes_accessed = (x.size * 2 + mask.size * 4
                      + (w1.size + w2.size + w3.size) * 2
                      + hw.size * 4 + hb.size * 4 + B * NCLS * 4)
    cost = pl.CostEstimate(flops=flops, transcendentals=B * Cp * N,
                           bytes_accessed=bytes_accessed)

    kernel = functools.partial(_recon_train_kernel,
                               taps=taps, halo=HALO, inv_norm=inv_norm)

    logits3 = pl.pallas_call(
        kernel,
        out_shape=jax.ShapeDtypeStruct((B, 1, NCLS), jnp.float32),
        grid_spec=pltpu.PrefetchScalarGridSpec(
            num_scalar_prefetch=0,
            grid=(B,),
            in_specs=[
                pl.BlockSpec((None, Cp, N), lambda b: (b, 0, 0)),
                pl.BlockSpec((1, N), lambda b: (0, 0)),
                pl.BlockSpec((Lp, k1), lambda b: (0, 0)),
                pl.BlockSpec((Cp, k2), lambda b: (0, 0)),
                pl.BlockSpec((F, k3), lambda b: (0, 0)),
                pl.BlockSpec((F, NCLS), lambda b: (0, 0)),
                pl.BlockSpec((1, NCLS), lambda b: (0, 0)),
            ],
            out_specs=pl.BlockSpec((None, 1, NCLS), lambda b: (b, 0, 0)),
            scratch_shapes=[
                pltpu.VMEM((rows_h, N + 2 * HALO), jnp.float32),   # haloed act
                pltpu.VMEM((stack_rows, N), jnp.float32),          # stacked K
            ],
        ),
        compiler_params=pltpu.CompilerParams(
            dimension_semantics=("parallel",),        # B>=2 -> both v7x TCs busy
            vmem_limit_bytes=32 * 1024 * 1024),
        cost_estimate=cost,
    )(x, mask, w1, w2, w3, hw, hb)

    return logits3[:, 0, :]                                        # (B, NCLS)


# ---------------------------------------------------------------------------
# Pure-JAX reference (lax.conv) of the same synthesized network, for a
# tolerance check of the fused kernel (bf16 MXU operands vs f32 reference).
# ---------------------------------------------------------------------------
def _ref_forward(params, img):
    B, V, C, H, W = img.shape
    x = img.reshape(B * V, C, H, W)

    def conv(x, w9, b):
        co = w9.shape[1]
        w4 = jnp.transpose(w9.reshape(3, 3, co, -1), (2, 3, 0, 1))  # OIHW
        y = jax.lax.conv_general_dilated(
            x, w4, (1, 1), ((1, 1), (1, 1)),
            dimension_numbers=("NCHW", "OIHW", "NCHW"))
        return y + b.reshape(1, co, 1, 1)

    z = jax.nn.relu(conv(x, params["vae_enc_w"], params["vae_enc_b"]))
    r = jax.nn.sigmoid(conv(z, params["vae_dec_w"], params["vae_dec_b"]))
    f = jax.nn.relu(conv(r, params["bk_w"], params["bk_b"]))
    pooled = f.mean(axis=(2, 3)).reshape(B, V, -1).mean(axis=1)
    return pooled @ params["head_w"] + params["head_b"]


if __name__ == "__main__":
    B, V, C, H, W = 2, 2, 4, 16, 16
    params = init_params(C=C, latent=8, feat=16, num_classes=8)
    img = jax.random.uniform(jax.random.PRNGKey(0), (B, V, C, H, W), jnp.float32)

    out = recon_train_forward(params, img)
    jax.block_until_ready(out)
    assert out.shape == (B, 8) and out.dtype == jnp.float32

    ref = _ref_forward(params, img)
    max_err = float(jnp.max(jnp.abs(out - ref)))
    assert max_err < 3e-2, f"mismatch vs reference: max_err={max_err}"

    print("KERNEL_OK")
</pallas_src>

<mosaic_0001>
module attributes {stable_mosaic.version = 11 : i64} {
  func.func @_recon_train_kernel(%arg0: i32, %arg1: memref<1x8x768xbf16, #tpu.memory_space<vmem>>, %arg2: memref<1x768xf32, #tpu.memory_space<vmem>>, %arg3: memref<8x80xbf16, #tpu.memory_space<vmem>>, %arg4: memref<8x80xbf16, #tpu.memory_space<vmem>>, %arg5: memref<16x80xbf16, #tpu.memory_space<vmem>>, %arg6: memref<16x8xf32, #tpu.memory_space<vmem>>, %arg7: memref<1x8xf32, #tpu.memory_space<vmem>>, %arg8: memref<1x1x8xf32, #tpu.memory_space<vmem>>, %arg9: memref<8x1024xf32, #tpu.memory_space<vmem>>, %arg10: memref<80x768xf32, #tpu.memory_space<vmem>>) attributes {dimension_semantics = [#tpu.dimension_semantics<parallel>], iteration_bounds = array<i64: 2>, scalar_prefetch = 0 : i64, scratch_operands = 2 : i64, tpu.core_type = #tpu.core_type<tc>, window_params = [{transform_indices = @transform_0, window_bounds = array<i64: 1, 8, 768>}, {pipeline_mode = #tpu.pipeline_mode<synchronous>, transform_indices = @transform_1, window_bounds = array<i64: 1, 768>}, {pipeline_mode = #tpu.pipeline_mode<synchronous>, transform_indices = @transform_2, window_bounds = array<i64: 8, 80>}, {pipeline_mode = #tpu.pipeline_mode<synchronous>, transform_indices = @transform_3, window_bounds = array<i64: 8, 80>}, {pipeline_mode = #tpu.pipeline_mode<synchronous>, transform_indices = @transform_4, window_bounds = array<i64: 16, 80>}, {pipeline_mode = #tpu.pipeline_mode<synchronous>, transform_indices = @transform_5, window_bounds = array<i64: 16, 8>}, {pipeline_mode = #tpu.pipeline_mode<synchronous>, transform_indices = @transform_6, window_bounds = array<i64: 1, 8>}, {transform_indices = @transform_7, window_bounds = array<i64: 1, 1, 8>}]} {
    %c0 = arith.constant 0 : index
    %c0_0 = arith.constant 0 : index
    %0 = vector.load %arg2[%c0, %c0_0] : memref<1x768xf32, #tpu.memory_space<vmem>>, vector<1x768xf32>
    %1 = tpu.iota {dimensions = array<i32: 0>} : vector<8x768xi32>
    %c0_i32 = arith.constant 0 : i32
    %2 = vector.broadcast %c0_i32 : i32 to vector<8x768xi32>
    %3 = arith.cmpi eq, %1, %2 : vector<8x768xi32>
    %4 = arith.extui %3 : vector<8x768xi1> to vector<8x768xi32>
    %5 = arith.sitofp %4 : vector<8x768xi32> to vector<8x768xf32>
    %cst = arith.constant 0.000000e+00 : f32
    %6 = vector.broadcast %cst : f32 to vector<8x1024xf32>
    %c0_1 = arith.constant 0 : index
    %c0_2 = arith.constant 0 : index
    %7 = vector.load %arg9[%c0_1, %c0_2] : memref<8x1024xf32, #tpu.memory_space<vmem>>, vector<8x1024xf32>
    tpu.vector_store %arg9[%c0_1, %c0_2], %6 {strides = array<i32>} : memref<8x1024xf32, #tpu.memory_space<vmem>>, vector<8x1024xf32>,
    %c0_3 = arith.constant 0 : index
    %c0_4 = arith.constant 0 : index
    %c0_5 = arith.constant 0 : index
    %8 = vector.load %arg1[%c0_3, %c0_4, %c0_5] : memref<1x8x768xbf16, #tpu.memory_space<vmem>>, vector<1x8x768xbf16>
    %9 = vector.shape_cast %8 : vector<1x8x768xbf16> to vector<8x768xbf16>
    %10 = arith.extf %9 : vector<8x768xbf16> to vector<8x768xf32>
    %c0_6 = arith.constant 0 : index
    %c128 = arith.constant 128 : index
    %11 = vector.load %arg9[%c0_6, %c128] : memref<8x1024xf32, #tpu.memory_space<vmem>>, vector<8x768xf32>
    tpu.vector_store %arg9[%c0_6, %c128], %10 {strides = array<i32>} : memref<8x1024xf32, #tpu.memory_space<vmem>>, vector<8x768xf32>,
    %c0_7 = arith.constant 0 : index
    %c109 = arith.constant 109 : index
    %12 = vector.load %arg9[%c0_7, %c109] : memref<8x1024xf32, #tpu.memory_space<vmem>>, vector<8x768xf32>
    %c0_8 = arith.constant 0 : index
    %c0_9 = arith.constant 0 : index
    %13 = vector.load %arg10[%c0_8, %c0_9] : memref<80x768xf32, #tpu.memory_space<vmem>>, vector<8x768xf32>
    tpu.vector_store %arg10[%c0_8, %c0_9], %12 {strides = array<i32>} : memref<80x768xf32, #tpu.memory_space<vmem>>, vector<8x768xf32>,
    %c0_10 = arith.constant 0 : index
    %c110 = arith.constant 110 : index
    %14 = vector.load %arg9[%c0_10, %c110] : memref<8x1024xf32, #tpu.memory_space<vmem>>, vector<8x768xf32>
    %c8 = arith.constant 8 : index
    %c0_11 = arith.constant 0 : index
    %15 = vector.load %arg10[%c8, %c0_11] : memref<80x768xf32, #tpu.memory_space<vmem>>, vector<8x768xf32>
    tpu.vector_store %arg10[%c8, %c0_11], %14 {strides = array<i32>} : memref<80x768xf32, #tpu.memory_space<vmem>>, vector<8x768xf32>,
    %c0_12 = arith.constant 0 : index
    %c111 = arith.constant 111 : index
    %16 = vector.load %arg9[%c0_12, %c111] : memref<8x1024xf32, #tpu.memory_space<vmem>>, vector<8x768xf32>
    %c16 = arith.constant 16 : index
    %c0_13 = arith.constant 0 : index
    %17 = vector.load %arg10[%c16, %c0_13] : memref<80x768xf32, #tpu.memory_space<vmem>>, vector<8x768xf32>
    tpu.vector_store %arg10[%c16, %c0_13], %16 {strides = array<i32>} : memref<80x768xf32, #tpu.memory_space<vmem>>, vector<8x768xf32>,
    %c0_14 = arith.constant 0 : index
    %c127 = arith.constant 127 : index
    %18 = vector.load %arg9[%c0_14, %c127] : memref<8x1024xf32, #tpu.memory_space<vmem>>, vector<8x768xf32>
    %c24 = arith.constant 24 : index
    %c0_15 = arith.constant 0 : index
    %19 = vector.load %arg10[%c24, %c0_15] : memref<80x768xf32, #tpu.memory_space<vmem>>, vector<8x768xf32>
    tpu.vector_store %arg10[%c24, %c0_15], %18 {strides = array<i32>} : memref<80x768xf32, #tpu.memory_space<vmem>>, vector<8x768xf32>,
    %c0_16 = arith.constant 0 : index
    %c128_17 = arith.constant 128 : index
    %20 = vector.load %arg9[%c0_16, %c128_17] : memref<8x1024xf32, #tpu.memory_space<vmem>>, vector<8x768xf32>
    %c32 = arith.constant 32 : index
    %c0_18 = arith.constant 0 : index
    %21 = vector.load %arg10[%c32, %c0_18] : memref<80x768xf32, #tpu.memory_space<vmem>>, vector<8x768xf32>
    tpu.vector_store %arg10[%c32, %c0_18], %20 {strides = array<i32>} : memref<80x768xf32, #tpu.memory_space<vmem>>, vector<8x768xf32>,
    %c0_19 = arith.constant 0 : index
    %c129 = arith.constant 129 : index
    %22 = vector.load %arg9[%c0_19, %c129] : memref<8x1024xf32, #tpu.memory_space<vmem>>, vector<8x768xf32>
    %c40 = arith.constant 40 : index
    %c0_20 = arith.constant 0 : index
    %23 = vector.load %arg10[%c40, %c0_20] : memref<80x768xf32, #tpu.memory_space<vmem>>, vector<8x768xf32>
    tpu.vector_store %arg10[%c40, %c0_20], %22 {strides = array<i32>} : memref<80x768xf32, #tpu.memory_space<vmem>>, vector<8x768xf32>,
    %c0_21 = arith.constant 0 : index
    %c145 = arith.constant 145 : index
    %24 = vector.load %arg9[%c0_21, %c145] : memref<8x1024xf32, #tpu.memory_space<vmem>>, vector<8x768xf32>
    %c48 = arith.constant 48 : index
    %c0_22 = arith.constant 0 : index
    %25 = vector.load %arg10[%c48, %c0_22] : memref<80x768xf32, #tpu.memory_space<vmem>>, vector<8x768xf32>
    tpu.vector_store %arg10[%c48, %c0_22], %24 {strides = array<i32>} : memref<80x768xf32, #tpu.memory_space<vmem>>, vector<8x768xf32>,
    %c0_23 = arith.constant 0 : index
    %c146 = arith.constant 146 : index
    %26 = vector.load %arg9[%c0_23, %c146] : memref<8x1024xf32, #tpu.memory_space<vmem>>, vector<8x768xf32>
    %c56 = arith.constant 56 : index
    %c0_24 = arith.constant 0 : index
    %27 = vector.load %arg10[%c56, %c0_24] : memref<80x768xf32, #tpu.memory_space<vmem>>, vector<8x768xf32>
    tpu.vector_store %arg10[%c56, %c0_24], %26 {strides = array<i32>} : memref<80x768xf32, #tpu.memory_space<vmem>>, vector<8x768xf32>,
    %c0_25 = arith.constant 0 : index
    %c147 = arith.constant 147 : index
    %28 = vector.load %arg9[%c0_25, %c147] : memref<8x1024xf32, #tpu.memory_space<vmem>>, vector<8x768xf32>
    %c64 = arith.constant 64 : index
    %c0_26 = arith.constant 0 : index
    %29 = vector.load %arg10[%c64, %c0_26] : memref<80x768xf32, #tpu.memory_space<vmem>>, vector<8x768xf32>
    tpu.vector_store %arg10[%c64, %c0_26], %28 {strides = array<i32>} : memref<80x768xf32, #tpu.memory_space<vmem>>, vector<8x768xf32>,
    %c72 = arith.constant 72 : index
    %c0_27 = arith.constant 0 : index
    %30 = vector.load %arg10[%c72, %c0_27] : memref<80x768xf32, #tpu.memory_space<vmem>>, vector<8x768xf32>
    tpu.vector_store %arg10[%c72, %c0_27], %5 {strides = array<i32>} : memref<80x768xf32, #tpu.memory_space<vmem>>, vector<8x768xf32>,
    %c0_28 = arith.constant 0 : index
    %c0_29 = arith.constant 0 : index
    %31 = vector.load %arg10[%c0_28, %c0_29] : memref<80x768xf32, #tpu.memory_space<vmem>>, vector<80x768xf32>
    %32 = arith.truncf %31 : vector<80x768xf32> to vector<80x768xbf16>
    %c0_30 = arith.constant 0 : index
    %c0_31 = arith.constant 0 : index
    %33 = vector.load %arg3[%c0_30, %c0_31] : memref<8x80xbf16, #tpu.memory_space<vmem>>, vector<8x80xbf16>
    %cst_32 = arith.constant dense<0.000000e+00> : vector<8x768xf32>
    %34 = tpu.matmul %33, %32, %cst_32 {dimension_numbers = #tpu.dot_dimension_numbers<[1], [0], [0], [1], [0, 0, 1, 1], [], []>} : vector<8x80xbf16>, vector<80x768xbf16>, vector<8x768xf32> -> vector<8x768xf32>
    %cst_33 = arith.constant 0.000000e+00 : f32
    %35 = vector.broadcast %cst_33 : f32 to vector<8x768xf32>
    %36 = arith.maximumf %34, %35 : vector<8x768xf32>
    %37 = vector.broadcast %0 : vector<1x768xf32> to vector<8x768xf32>
    %38 = arith.mulf %36, %37 : vector<8x768xf32>
    %c0_34 = arith.constant 0 : index
    %c128_35 = arith.constant 128 : index
    %39 = vector.load %arg9[%c0_34, %c128_35] : memref<8x1024xf32, #tpu.memory_space<vmem>>, vector<8x768xf32>
    tpu.vector_store %arg9[%c0_34, %c128_35], %38 {strides = array<i32>} : memref<8x1024xf32, #tpu.memory_space<vmem>>, vector<8x768xf32>,
    %c0_36 = arith.constant 0 : index
    %c109_37 = arith.constant 109 : index
    %40 = vector.load %arg9[%c0_36, %c109_37] : memref<8x1024xf32, #tpu.memory_space<vmem>>, vector<8x768xf32>
    %c0_38 = arith.constant 0 : index
    %c0_39 = arith.constant 0 : index
    %41 = vector.load %arg10[%c0_38, %c0_39] : memref<80x768xf32, #tpu.memory_space<vmem>>, vector<8x768xf32>
    tpu.vector_store %arg10[%c0_38, %c0_39], %40 {strides = array<i32>} : memref<80x768xf32, #tpu.memory_space<vmem>>, vector<8x768xf32>,
    %c0_40 = arith.constant 0 : index
    %c110_41 = arith.constant 110 : index
    %42 = vector.load %arg9[%c0_40, %c110_41] : memref<8x1024xf32, #tpu.memory_space<vmem>>, vector<8x768xf32>
    %c8_42 = arith.constant 8 : index
    %c0_43 = arith.constant 0 : index
    %43 = vector.load %arg10[%c8_42, %c0_43] : memref<80x768xf32, #tpu.memory_space<vmem>>, vector<8x768xf32>
    tpu.vector_store %arg10[%c8_42, %c0_43], %42 {strides = array<i32>} : memref<80x768xf32, #tpu.memory_space<vmem>>, vector<8x768xf32>,
    %c0_44 = arith.constant 0 : index
    %c111_45 = arith.constant 111 : index
    %44 = vector.load %arg9[%c0_44, %c111_45] : memref<8x1024xf32, #tpu.memory_space<vmem>>, vector<8x768xf32>
    %c16_46 = arith.constant 16 : index
    %c0_47 = arith.constant 0 : index
    %45 = vector.load %arg10[%c16_46, %c0_47] : memref<80x768xf32, #tpu.memory_space<vmem>>, vector<8x768xf32>
    tpu.vector_store %arg10[%c16_46, %c0_47], %44 {strides = array<i32>} : memref<80x768xf32, #tpu.memory_space<vmem>>, vector<8x768xf32>,
    %c0_48 = arith.constant 0 : index
    %c127_49 = arith.constant 127 : index
    %46 = vector.load %arg9[%c0_48, %c127_49] : memref<8x1024xf32, #tpu.memory_space<vmem>>, vector<8x768xf32>
    %c24_50 = arith.constant 24 : index
    %c0_51 = arith.constant 0 : index
    %47 = vector.load %arg10[%c24_50, %c0_51] : memref<80x768xf32, #tpu.memory_space<vmem>>, vector<8x768xf32>
    tpu.vector_store %arg10[%c24_50, %c0_51], %46 {strides = array<i32>} : memref<80x768xf32, #tpu.memory_space<vmem>>, vector<8x768xf32>,
    %c0_52 = arith.constant 0 : index
    %c128_53 = arith.constant 128 : index
    %48 = vector.load %arg9[%c0_52, %c128_53] : memref<8x1024xf32, #tpu.memory_space<vmem>>, vector<8x768xf32>
    %c32_54 = arith.constant 32 : index
    %c0_55 = arith.constant 0 : index
    %49 = vector.load %arg10[%c32_54, %c0_55] : memref<80x768xf32, #tpu.memory_space<vmem>>, vector<8x768xf32>
    tpu.vector_store %arg10[%c32_54, %c0_55], %48 {strides = array<i32>} : memref<80x768xf32, #tpu.memory_space<vmem>>, vector<8x768xf32>,
    %c0_56 = arith.constant 0 : index
    %c129_57 = arith.constant 129 : index
    %50 = vector.load %arg9[%c0_56, %c129_57] : memref<8x1024xf32, #tpu.memory_space<vmem>>, vector<8x768xf32>
    %c40_58 = arith.constant 40 : index
    %c0_59 = arith.constant 0 : index
    %51 = vector.load %arg10[%c40_58, %c0_59] : memref<80x768xf32, #tpu.memory_space<vmem>>, vector<8x768xf32>
    tpu.vector_store %arg10[%c40_58, %c0_59], %50 {strides = array<i32>} : memref<80x768xf32, #tpu.memory_space<vmem>>, vector<8x768xf32>,
    %c0_60 = arith.constant 0 : index
    %c145_61 = arith.constant 145 : index
    %52 = vector.load %arg9[%c0_60, %c145_61] : memref<8x1024xf32, #tpu.memory_space<vmem>>, vector<8x768xf32>
    %c48_62 = arith.constant 48 : index
    %c0_63 = arith.constant 0 : index
    %53 = vector.load %arg10[%c48_62, %c0_63] : memref<80x768xf32, #tpu.memory_space<vmem>>, vector<8x768xf32>
    tpu.vector_store %arg10[%c48_62, %c0_63], %52 {strides = array<i32>} : memref<80x768xf32, #tpu.memory_space<vmem>>, vector<8x768xf32>,
    %c0_64 = arith.constant 0 : index
    %c146_65 = arith.constant 146 : index
    %54 = vector.load %arg9[%c0_64, %c146_65] : memref<8x1024xf32, #tpu.memory_space<vmem>>, vector<8x768xf32>
    %c56_66 = arith.constant 56 : index
    %c0_67 = arith.constant 0 : index
    %55 = vector.load %arg10[%c56_66, %c0_67] : memref<80x768xf32, #tpu.memory_space<vmem>>, vector<8x768xf32>
    tpu.vector_store %arg10[%c56_66, %c0_67], %54 {strides = array<i32>} : memref<80x768xf32, #tpu.memory_space<vmem>>, vector<8x768xf32>,
    %c0_68 = arith.constant 0 : index
    %c147_69 = arith.constant 147 : index
    %56 = vector.load %arg9[%c0_68, %c147_69] : memref<8x1024xf32, #tpu.memory_space<vmem>>, vector<8x768xf32>
    %c64_70 = arith.constant 64 : index
    %c0_71 = arith.constant 0 : index
    %57 = vector.load %arg10[%c64_70, %c0_71] : memref<80x768xf32, #tpu.memory_space<vmem>>, vector<8x768xf32>
    tpu.vector_store %arg10[%c64_70, %c0_71], %56 {strides = array<i32>} : memref<80x768xf32, #tpu.memory_space<vmem>>, vector<8x768xf32>,
    %c72_72 = arith.constant 72 : index
    %c0_73 = arith.constant 0 : index
    %58 = vector.load %arg10[%c72_72, %c0_73] : memref<80x768xf32, #tpu.memory_space<vmem>>, vector<8x768xf32>
    tpu.vector_store %arg10[%c72_72, %c0_73], %5 {strides = array<i32>} : memref<80x768xf32, #tpu.memory_space<vmem>>, vector<8x768xf32>,
    %c0_74 = arith.constant 0 : index
    %c0_75 = arith.constant 0 : index
    %59 = vector.load %arg10[%c0_74, %c0_75] : memref<80x768xf32, #tpu.memory_space<vmem>>, vector<80x768xf32>
    %60 = arith.truncf %59 : vector<80x768xf32> to vector<80x768xbf16>
    %c0_76 = arith.constant 0 : index
    %c0_77 = arith.constant 0 : index
    %61 = vector.load %arg4[%c0_76, %c0_77] : memref<8x80xbf16, #tpu.memory_space<vmem>>, vector<8x80xbf16>
    %cst_78 = arith.constant dense<0.000000e+00> : vector<8x768xf32>
    %62 = tpu.matmul %61, %60, %cst_78 {dimension_numbers = #tpu.dot_dimension_numbers<[1], [0], [0], [1], [0, 0, 1, 1], [], []>} : vector<8x80xbf16>, vector<80x768xbf16>, vector<8x768xf32> -> vector<8x768xf32>
    %63 = arith.negf %62 : vector<8x768xf32>
    %64 = math.exp %63 : vector<8x768xf32>
    %cst_79 = arith.constant 1.000000e+00 : f32
    %65 = vector.broadcast %cst_79 : f32 to vector<8x768xf32>
    %66 = arith.addf %65, %64 : vector<8x768xf32>
    %67 = arith.divf %65, %66 : vector<8x768xf32>
    %68 = vector.broadcast %0 : vector<1x768xf32> to vector<8x768xf32>
    %69 = arith.mulf %67, %68 : vector<8x768xf32>
    %c0_80 = arith.constant 0 : index
    %c128_81 = arith.constant 128 : index
    %70 = vector.load %arg9[%c0_80, %c128_81] : memref<8x1024xf32, #tpu.memory_space<vmem>>, vector<8x768xf32>
    tpu.vector_store %arg9[%c0_80, %c128_81], %69 {strides = array<i32>} : memref<8x1024xf32, #tpu.memory_space<vmem>>, vector<8x768xf32>,
    %c0_82 = arith.constant 0 : index
    %c109_83 = arith.constant 109 : index
    %71 = vector.load %arg9[%c0_82, %c109_83] : memref<8x1024xf32, #tpu.memory_space<vmem>>, vector<8x768xf32>
    %c0_84 = arith.constant 0 : index
    %c0_85 = arith.constant 0 : index
    %72 = vector.load %arg10[%c0_84, %c0_85] : memref<80x768xf32, #tpu.memory_space<vmem>>, vector<8x768xf32>
    tpu.vector_store %arg10[%c0_84, %c0_85], %71 {strides = array<i32>} : memref<80x768xf32, #tpu.memory_space<vmem>>, vector<8x768xf32>,
    %c0_86 = arith.constant 0 : index
    %c110_87 = arith.constant 110 : index
    %73 = vector.load %arg9[%c0_86, %c110_87] : memref<8x1024xf32, #tpu.memory_space<vmem>>, vector<8x768xf32>
    %c8_88 = arith.constant 8 : index
    %c0_89 = arith.constant 0 : index
    %74 = vector.load %arg10[%c8_88, %c0_89] : memref<80x768xf32, #tpu.memory_space<vmem>>, vector<8x768xf32>
    tpu.vector_store %arg10[%c8_88, %c0_89], %73 {strides = array<i32>} : memref<80x768xf32, #tpu.memory_space<vmem>>, vector<8x768xf32>,
    %c0_90 = arith.constant 0 : index
    %c111_91 = arith.constant 111 : index
    %75 = vector.load %arg9[%c0_90, %c111_91] : memref<8x1024xf32, #tpu.memory_space<vmem>>, vector<8x768xf32>
    %c16_92 = arith.constant 16 : index
    %c0_93 = arith.constant 0 : index
    %76 = vector.load %arg10[%c16_92, %c0_93] : memref<80x768xf32, #tpu.memory_space<vmem>>, vector<8x768xf32>
    tpu.vector_store %arg10[%c16_92, %c0_93], %75 {strides = array<i32>} : memref<80x768xf32, #tpu.memory_space<vmem>>, vector<8x768xf32>,
    %c0_94 = arith.constant 0 : index
    %c127_95 = arith.constant 127 : index
    %77 = vector.load %arg9[%c0_94, %c127_95] : memref<8x1024xf32, #tpu.memory_space<vmem>>, vector<8x768xf32>
    %c24_96 = arith.constant 24 : index
    %c0_97 = arith.constant 0 : index
    %78 = vector.load %arg10[%c24_96, %c0_97] : memref<80x768xf32, #tpu.memory_space<vmem>>, vector<8x768xf32>
    tpu.vector_store %arg10[%c24_96, %c0_97], %77 {strides = array<i32>} : memref<80x768xf32, #tpu.memory_space<vmem>>, vector<8x768xf32>,
    %c0_98 = arith.constant 0 : index
    %c128_99 = arith.constant 128 : index
    %79 = vector.load %arg9[%c0_98, %c128_99] : memref<8x1024xf32, #tpu.memory_space<vmem>>, vector<8x768xf32>
    %c32_100 = arith.constant 32 : index
    %c0_101 = arith.constant 0 : index
    %80 = vector.load %arg10[%c32_100, %c0_101] : memref<80x768xf32, #tpu.memory_space<vmem>>, vector<8x768xf32>
    tpu.vector_store %arg10[%c32_100, %c0_101], %79 {strides = array<i32>} : memref<80x768xf32, #tpu.memory_space<vmem>>, vector<8x768xf32>,
    %c0_102 = arith.constant 0 : index
    %c129_103 = arith.constant 129 : index
    %81 = vector.load %arg9[%c0_102, %c129_103] : memref<8x1024xf32, #tpu.memory_space<vmem>>, vector<8x768xf32>
    %c40_104 = arith.constant 40 : index
    %c0_105 = arith.constant 0 : index
    %82 = vector.load %arg10[%c40_104, %c0_105] : memref<80x768xf32, #tpu.memory_space<vmem>>, vector<8x768xf32>
    tpu.vector_store %arg10[%c40_104, %c0_105], %81 {strides = array<i32>} : memref<80x768xf32, #tpu.memory_space<vmem>>, vector<8x768xf32>,
    %c0_106 = arith.constant 0 : index
    %c145_107 = arith.constant 145 : index
    %83 = vector.load %arg9[%c0_106, %c145_107] : memref<8x1024xf32, #tpu.memory_space<vmem>>, vector<8x768xf32>
    %c48_108 = arith.constant 48 : index
    %c0_109 = arith.constant 0 : index
    %84 = vector.load %arg10[%c48_108, %c0_109] : memref<80x768xf32, #tpu.memory_space<vmem>>, vector<8x768xf32>
    tpu.vector_store %arg10[%c48_108, %c0_109], %83 {strides = array<i32>} : memref<80x768xf32, #tpu.memory_space<vmem>>, vector<8x768xf32>,
    %c0_110 = arith.constant 0 : index
    %c146_111 = arith.constant 146 : index
    %85 = vector.load %arg9[%c0_110, %c146_111] : memref<8x1024xf32, #tpu.memory_space<vmem>>, vector<8x768xf32>
    %c56_112 = arith.constant 56 : index
    %c0_113 = arith.constant 0 : index
    %86 = vector.load %arg10[%c56_112, %c0_113] : memref<80x768xf32, #tpu.memory_space<vmem>>, vector<8x768xf32>
    tpu.vector_store %arg10[%c56_112, %c0_113], %85 {strides = array<i32>} : memref<80x768xf32, #tpu.memory_space<vmem>>, vector<8x768xf32>,
    %c0_114 = arith.constant 0 : index
    %c147_115 = arith.constant 147 : index
    %87 = vector.load %arg9[%c0_114, %c147_115] : memref<8x1024xf32, #tpu.memory_space<vmem>>, vector<8x768xf32>
    %c64_116 = arith.constant 64 : index
    %c0_117 = arith.constant 0 : index
    %88 = vector.load %arg10[%c64_116, %c0_117] : memref<80x768xf32, #tpu.memory_space<vmem>>, vector<8x768xf32>
    tpu.vector_store %arg10[%c64_116, %c0_117], %87 {strides = array<i32>} : memref<80x768xf32, #tpu.memory_space<vmem>>, vector<8x768xf32>,
    %c72_118 = arith.constant 72 : index
    %c0_119 = arith.constant 0 : index
    %89 = vector.load %arg10[%c72_118, %c0_119] : memref<80x768xf32, #tpu.memory_space<vmem>>, vector<8x768xf32>
    tpu.vector_store %arg10[%c72_118, %c0_119], %5 {strides = array<i32>} : memref<80x768xf32, #tpu.memory_space<vmem>>, vector<8x768xf32>,
    %c0_120 = arith.constant 0 : index
    %c0_121 = arith.constant 0 : index
    %90 = vector.load %arg10[%c0_120, %c0_121] : memref<80x768xf32, #tpu.memory_space<vmem>>, vector<80x768xf32>
    %91 = arith.truncf %90 : vector<80x768xf32> to vector<80x768xbf16>
    %c0_122 = arith.constant 0 : index
    %c0_123 = arith.constant 0 : index
    %92 = vector.load %arg5[%c0_122, %c0_123] : memref<16x80xbf16, #tpu.memory_space<vmem>>, vector<16x80xbf16>
    %cst_124 = arith.constant dense<0.000000e+00> : vector<16x768xf32>
    %93 = tpu.matmul %92, %91, %cst_124 {dimension_numbers = #tpu.dot_dimension_numbers<[1], [0], [0], [1], [0, 0, 1, 1], [], []>} : vector<16x80xbf16>, vector<80x768xbf16>, vector<16x768xf32> -> vector<16x768xf32>
    %cst_125 = arith.constant 0.000000e+00 : f32
    %94 = vector.broadcast %cst_125 : f32 to vector<16x768xf32>
    %95 = arith.maximumf %93, %94 : vector<16x768xf32>
    %96 = vector.broadcast %0 : vector<1x768xf32> to vector<16x768xf32>
    %97 = arith.mulf %95, %96 : vector<16x768xf32>
    %cst_126 = arith.constant dense<0.000000e+00> : vector<16xf32>
    %98 = vector.multi_reduction <add>, %97, %cst_126 [1] : vector<16x768xf32> to vector<16xf32>
    %99 = vector.shape_cast %98 : vector<16xf32> to vector<16x1xf32>
    %cst_127 = arith.constant 0.001953125 : f32
    %100 = vector.broadcast %cst_127 : f32 to vector<16x1xf32>
    %101 = arith.mulf %99, %100 : vector<16x1xf32>
    %c0_128 = arith.constant 0 : index
    %c0_129 = arith.constant 0 : index
    %102 = vector.load %arg6[%c0_128, %c0_129] : memref<16x8xf32, #tpu.memory_space<vmem>>, vector<16x8xf32>
    %103 = vector.broadcast %101 : vector<16x1xf32> to vector<16x8xf32>
    %104 = arith.mulf %103, %102 : vector<16x8xf32>
    %cst_130 = arith.constant dense<0.000000e+00> : vector<8xf32>
    %105 = vector.multi_reduction <add>, %104, %cst_130 [0] : vector<16x8xf32> to vector<8xf32>
    %106 = vector.shape_cast %105 : vector<8xf32> to vector<1x8xf32>
    %c0_131 = arith.constant 0 : index
    %c0_132 = arith.constant 0 : index
    %107 = vector.load %arg7[%c0_131, %c0_132] : memref<1x8xf32, #tpu.memory_space<vmem>>, vector<1x8xf32>
    %108 = arith.addf %106, %107 : vector<1x8xf32>
    %c0_133 = arith.constant 0 : index
    %c0_134 = arith.constant 0 : index
    %c0_135 = arith.constant 0 : index
    %109 = vector.load %arg8[%c0_133, %c0_134, %c0_135] : memref<1x1x8xf32, #tpu.memory_space<vmem>>, vector<1x1x8xf32>
    %110 = vector.shape_cast %109 : vector<1x1x8xf32> to vector<1x8xf32>
    %111 = vector.shape_cast %108 : vector<1x8xf32> to vector<1x1x8xf32>
    tpu.vector_store %arg8[%c0_133, %c0_134, %c0_135], %111 {strides = array<i32>} : memref<1x1x8xf32, #tpu.memory_space<vmem>>, vector<1x1x8xf32>,
    return
  }
  func.func @transform_0(%arg0: i32) -> (i32, i32, i32) {
    %c0_i32 = arith.constant 0 : i32
    %c0_i32_0 = arith.constant 0 : i32
    %c0_i32_1 = arith.constant 0 : i32
    return %arg0, %c0_i32, %c0_i32_0 : i32, i32, i32
  }
  func.func @transform_1(%arg0: i32) -> (i32, i32) {
    %c0_i32 = arith.constant 0 : i32
    %c0_i32_0 = arith.constant 0 : i32
    %c0_i32_1 = arith.constant 0 : i32
    return %c0_i32, %c0_i32_0 : i32, i32
  }
  func.func @transform_2(%arg0: i32) -> (i32, i32) {
    %c0_i32 = arith.constant 0 : i32
    %c0_i32_0 = arith.constant 0 : i32
    %c0_i32_1 = arith.constant 0 : i32
    return %c0_i32, %c0_i32_0 : i32, i32
  }
  func.func @transform_3(%arg0: i32) -> (i32, i32) {
    %c0_i32 = arith.constant 0 : i32
    %c0_i32_0 = arith.constant 0 : i32
    %c0_i32_1 = arith.constant 0 : i32
    return %c0_i32, %c0_i32_0 : i32, i32
  }
  func.func @transform_4(%arg0: i32) -> (i32, i32) {
    %c0_i32 = arith.constant 0 : i32
    %c0_i32_0 = arith.constant 0 : i32
    %c0_i32_1 = arith.constant 0 : i32
    return %c0_i32, %c0_i32_0 : i32, i32
  }
  func.func @transform_5(%arg0: i32) -> (i32, i32) {
    %c0_i32 = arith.constant 0 : i32
    %c0_i32_0 = arith.constant 0 : i32
    %c0_i32_1 = arith.constant 0 : i32
    return %c0_i32, %c0_i32_0 : i32, i32
  }
  func.func @transform_6(%arg0: i32) -> (i32, i32) {
    %c0_i32 = arith.constant 0 : i32
    %c0_i32_0 = arith.constant 0 : i32
    %c0_i32_1 = arith.constant 0 : i32
    return %c0_i32, %c0_i32_0 : i32, i32
  }
  func.func @transform_7(%arg0: i32) -> (i32, i32, i32) {
    %c0_i32 = arith.constant 0 : i32
    %c0_i32_0 = arith.constant 0 : i32
    %c0_i32_1 = arith.constant 0 : i32
    return %arg0, %c0_i32, %c0_i32_0 : i32, i32, i32
  }
}

</mosaic_0001>

<bundles_post_ra>
// kernel: recon_train_forward.1
= control target key start
LH: loop header
LB: loop body
LE: loop exit
PB: predicated region body
PF: predicated region fallthrough
CT: control target
= control target key end

     0   :  { %12 = vsyncpa [#allocation5], 0  ;;  %s3924_s0 = inlined_call_operand.vmem [shape: bf16[2,8,768], index: 0, kind: input, shape index: {}]   ;;  %s3925_s1 = inlined_call_operand.vmem [shape: f32[1,768], index: 1, kind: input, shape index: {}]   ;;  %s3926_s2 = inlined_call_operand.vmem [shape: bf16[8,80], index: 2, kind: input, shape index: {}]   ;;  %s3927_s3 = inlined_call_operand.vmem [shape: bf16[8,80], index: 3, kind: input, shape index: {}]   ;;  %s3928_s4 = inlined_call_operand.vmem [shape: bf16[16,80], index: 4, kind: input, shape index: {}]   ;;  %s3929_s5 = inlined_call_operand.vmem [shape: f32[16,8], index: 5, kind: input, shape index: {}]   ;;  %s3930_s6 = inlined_call_operand.vmem [shape: f32[1,8], index: 6, kind: input, shape index: {}]   ;;  %s3931_s7 = inlined_call_operand.hbm [shape: f32[2,1,8], index: 7, kind: output, shape index: {}]  }
   0x1   :  { %14 = vsyncpa [#allocation5 + $0x1], 0  ;;  %s2992_s24 = smov 0   ;;  %s2994_s25 = smov 0  }
   0x2   :  { %s2996_s26 = smov 0   ;;  %s2998_s27 = smov 0  }
   0x3 LB: > { %s3013_s28 = sadd.s32 4294967295, %s2937_s27   ;;  %s2359_s29 = sadd.s32 4294967294, %s2937_s27   ;;  %s2937_s27 = sphi %s2998_s27, %s3939_s27   ;;  %s2933_s26 = sphi %s2996_s26, %s3938_s26   ;;  %s2929_s25 = sphi %s2994_s25, %s3937_s25   ;;  %s2925_s24 = sphi %s2992_s24, %s3936_s24  }
   0x4   : > { %s3017_s30 = sadd.s32 1, %s2937_s27   ;;  %s179_s8 = sadd.s32 1, %s2933_s26 }
   0x5   : > { %s176_s9 = ssub.s32 %s2937_s27, %s3017_s30  ;;  %p189_p0 = scmp.ne.s32.totalorder %s2933_s26, %s2929_s25 }
   0x6   : > { %p177_p1 = scmp.eq.s32.totalorder %s176_s9, 0  ;;  %p190_p2 = scmp.eq.s32.totalorder %s3013_s28, 1 }
   0x7   : > { %p195_p3 = scmp.ne.s32.totalorder %s2929_s25, %s2925_s24  ;;  %p196_p4 = scmp.eq.s32.totalorder %s2359_s29, 1 }
   0x8   : > { %s3028_s10 = scalar_select %p177_p1, %s2933_s26, %s179_s8  }
   0x9   : > { %p3030_p5 = por %p190_p2, %p189_p0  ;;  %p3034_p6 = por %p196_p4, %p195_p3 }
   0xa   : > { %p2362_p7 = scmp.ge.s32.totalorder %s2937_s27, 1  ;;  %p240_p8 = scmp.lt.s32.totalorder %s2937_s27, 3 }
   0xc   : > { %p241_p9 = pnand %p2362_p7, %p240_p8 }
   0xd   : > { %p271_p10 = scmp.lt.s32.totalorder (!%p241_p9), %s3013_s28, 1  ;;  %s2939_s18 = smov (!%p241_p9), 19   ;;  %v2946_v12 = vmov (!%p241_p9), 0   ;;  %v2948_v14 = vmov (!%p241_p9), 0.0   ;;  %vm334_vm0 = vcmask (!%p241_p9), 154624   ;;  %vm381_vm1 = vcmask (!%p241_p9), 146432  }
   0xe   : > { %244 = sbr.rel (%p241_p9) target bundleno = 1420 (0x58c), region = 48  ;;  %s2940_s19 = smov (!%p241_p9), 18   ;;  %827 = vmatprep.mubr.bf16.mxu0 (!%p241_p9), %v2946_v12  ;;  %868 = vmatprep.mubr.bf16.mxu1 (!%p241_p9), %v2946_v12  ;;  %vm428_vm2 = vcmask (!%p241_p9), 138240   ;;  %vm475_vm3 = vcmask (!%p241_p9), 7168   ;;  %vm534_vm4 = vcmask (!%p241_p9), 1039360   ;;  %vm581_vm5 = vcmask (!%p241_p9), 908288  }
   0xf   : > { %s2941_s20 = smov (!%p241_p9), 1   ;;  %s2942_s21 = smov (!%p241_p9), 17   ;;  %vm628_vm6 = vcmask (!%p241_p9), 900096   ;;  %vm675_vm7 = vcmask (!%p241_p9), 891904   ;;  %vm2949_vm9 = vmmov (!%p241_p9), 1   ;;  %vm791_vm11 = vcmask (!%p241_p9), 654336  }
  0x10   : > { %s2943_s22 = smov (!%p241_p9), 127   ;;  %s2944_s23 = smov (!%p241_p9), 110   ;;  %vm2277_vm12 = vcmask (!%p241_p9), 64512   ;;  %vm2289_vm13 = vcmask (!%p241_p9), 57344  }
  0x11   : > { %s2945_s29 = smov (!%p241_p9), 111   ;;  %s2947_s8 = smov (!%p241_p9), 109  }
  0x15   : > { %s272_s13 = scalar_select %p271_p10, %s3013_s28, 1 }
  0x17   : > { %s2438_s14 = smul.u32 24, %s272_s13  ;;  %s2381_s13 = sshll.u32 %s3013_s28, 4 }
  0x18   : > { %s2951_s28 = smov [#allocation4]  }
  0x19   : > { %s275_s17 = scalar_lea.vmem %s3924_s0, %s2438_s14 }
  0x1a   : > { %v292_v0 = vld [vmem:[%s275_s17 + $0x8] sm:$0xff]  ;;  %v291_v1 = vld [vmem:[%s275_s17] sm:$0xff]  ;;  %v293_v7 = vld [vmem:[%s275_s17 + $0x10] sm:$0xff] }
  0x1b   : > { %v3045_v2 = vunpack.c.l.bf16 %v292_v0  ;;  %v3047_v3 = vunpack.c.l.bf16 %v291_v1  ;;  %v3049_v4 = vunpack.c.h.bf16 %v291_v1  ;;  %v3059_v6 = vunpack.c.h.bf16 %v292_v0 }
  0x1c   : > { %v3071_v10 = vunpack.c.l.bf16 %v293_v7  ;;  %v3089_v13 = vunpack.c.h.bf16 %v293_v7 }
  0x1d   : > { %v2490_v5 = vpack.i.bf16 %v3049_v4, %v3047_v3  ;;  %2501 = vrot.lane.b32.xlu1 %v3045_v2, %s2939_s18  ;;  %v2535_v8 = vpack.i.bf16 %v3059_v6, %v3047_v3  ;;  %v2530_v9 = vpack.i.bf16 %v3045_v2, %v3049_v4 }
  0x1e   : > { %v2545_v11 = vpack.i.bf16 %v3071_v10, %v3059_v6  ;;  %v2595_v15 = vpack.i.bf16 %v2948_v14, %v3089_v13 }
  0x1f   : > { %2491 = vrot.lane.b32.xlu0 %v2490_v5, %s2939_s18 }
  0x21   : > { %2506 = vrot.lane.b32.xlu1 %v3045_v2, %s2940_s19 }
  0x23   : > { %2496 = vrot.lane.b32.xlu0 %v2490_v5, %s2940_s19 }
  0x25   : > { %2516 = vrot.lane.b32.xlu1 %v2490_v5, %s2941_s20 }
  0x27   : > { %2511 = vrot.lane.b32.xlu0 %v2490_v5, %s2942_s21 }
  0x29   : > { %2526 = vrot.lane.b32.xlu1 %v3045_v2, %s2941_s20 }
  0x2b   : > { %2521 = vrot.lane.b32.xlu0 %v3045_v2, %s2942_s21 }
  0x2d   : > { %2536 = vrot.lane.b32.xlu1 %v2535_v8, %s2943_s22 }
  0x2f   : > { %2531 = vrot.lane.b32.xlu0 %v2530_v9, %s2943_s22 }
  0x31   : > { %2546 = vrot.lane.b32.xlu1 %v2545_v11, %s2940_s19 }
  0x33   : > { %2541 = vrot.lane.b32.xlu0 %v2545_v11, %s2939_s18 }
  0x35   : > { %2556 = vrot.lane.b32.xlu1 %v2530_v9, %s2944_s23 }
  0x37   : > { %2551 = vrot.lane.b32.xlu0 %v2530_v9, %s2945_s29 }
  0x39   : > { %2566 = vrot.lane.b32.xlu1 %v2535_v8, %s2944_s23 }
  0x3b   : > { %2561 = vrot.lane.b32.xlu0 %v2535_v8, %s2945_s29 }
  0x3d   : > { %2576 = vrot.lane.b32.xlu1 %v2545_v11, %s2941_s20 }
  0x3f   : > { %2571 = vrot.lane.b32.xlu0 %v2545_v11, %s2942_s21 }
  0x41   : > { %2586 = vrot.lane.b32.xlu1 %v2535_v8, %s2947_s8 }
  0x43   : > { %2581 = vrot.lane.b32.xlu0 %v2530_v9, %s2947_s8 }
  0x45   : > { %332 = vrot.lane.b32.xlu1 %v3089_v13, %s2939_s18 }
  0x47   : > { %528 = vrot.lane.b32.xlu0 %v3071_v10, %s2943_s22 }
  0x49   : > { %575 = vrot.lane.b32.xlu1 %v3071_v10, %s2945_s29 }
  0x4b   : > { %379 = vrot.lane.b32.xlu0 %v3089_v13, %s2940_s19 }
  0x4d   : > { %426 = vrot.lane.b32.xlu1 %v3089_v13, %s2942_s21 }
  0x4f   : > { %622 = vrot.lane.b32.xlu0 %v3071_v10, %s2944_s23 }
  0x51   : > { %669 = vrot.lane.b32.xlu1 %v3071_v10, %s2947_s8 }
  0x53   : > { %473 = vrot.lane.b32.xlu0 %v3089_v13, %s2941_s20 }
  0x55   : > { %2596 = vrot.lane.b32.xlu1 %v2595_v15, %s2945_s29 }
  0x57   : > { %2591 = vrot.lane.b32.xlu0 %v2595_v15, %s2943_s22 }
  0x59   : > { %2606 = vrot.lane.b32.xlu1 %v2595_v15, %s2947_s8 }
  0x5b   : > { %2601 = vrot.lane.b32.xlu0 %v2595_v15, %s2944_s23 }
  0x8f   : > { %v3113_v16 = vpop.permute.xlu1 %2501 }
  0x90   : > { %v2503_v18 = vunpack.i.l.bf16 %v3113_v16  ;;  %v2504_v54 = vunpack.i.h.bf16 %v3113_v16 }
  0x91   : > { %v2492_v17 = vpop.permute.xlu0 %2491 }
  0x92   : > { %v2494_v19 = vunpack.i.h.bf16 %v2492_v17  ;;  %v2493_v20 = vunpack.i.l.bf16 %v2492_v17 }
  0x93   : > { %v2507_v21 = vpop.permute.xlu1 %2506 }
  0x94   : > { %v2508_v23 = vunpack.i.l.bf16 %v2507_v21  ;;  %v336_v26 = vsel %vm334_vm0, %v2493_v20, %v2494_v19  ;;  %v335_v28 = vsel %vm334_vm0, %v2503_v18, %v2493_v20  ;;  %v2509_v50 = vunpack.i.h.bf16 %v2507_v21 }
  0x95   : > { %v2497_v22 = vpop.permute.xlu0 %2496 }
  0x96   : > { %v2499_v24 = vunpack.i.h.bf16 %v2497_v22  ;;  %v2498_v25 = vunpack.i.l.bf16 %v2497_v22  ;;  %v278_v22 = vlaneseq }
  0x97   : > { %v3120_v30 = vpop.permute.xlu1 %2516 }
  0x98   : > { %v383_v27 = vsel %vm381_vm1, %v2498_v25, %v2499_v24  ;;  %v382_v29 = vsel %vm381_vm1, %v2508_v23, %v2498_v25  ;;  %v2519_v34 = vunpack.i.h.bf16 %v3120_v30  ;;  %v2518_v35 = vunpack.i.l.bf16 %v3120_v30 }
  0x99   : > { %v3122_v31 = vpop.permute.xlu0 %2511  ;;  %v761_v32 = vpack.c.bf16 %v383_v27, %v336_v26  ;;  %v760_v33 = vpack.c.bf16 %v382_v29, %v335_v28  ;;  %v384_v63 = vsel %vm381_vm1, %v2499_v24, %v2509_v50 }
  0x9a   : > { %v2514_v36 = vunpack.i.h.bf16 %v3122_v31  ;;  %v2513_v37 = vunpack.i.l.bf16 %v3122_v31  ;;  %v477_v39 = vsel %vm475_vm3, %v2518_v35, %v2519_v34 }
  0x9b   : > { %795 = vmatprep.subr.bf16.mxu0 %v761_v32  ;;  %v3134_v40 = vpop.permute.xlu1 %2526 }
  0x9c   : > { %796 = vmatpush1.bf16.msra.mxu0 %v760_v33  ;;  %v430_v38 = vsel %vm428_vm2, %v2513_v37, %v2514_v36  ;;  %v2528_v43 = vunpack.i.l.bf16 %v3134_v40  ;;  %v2529_v25 = vunpack.i.h.bf16 %v3134_v40 }
  0x9d   : > { %v3136_v41 = vpop.permute.xlu0 %2521  ;;  %v767_v42 = vpack.c.bf16 %v477_v39, %v430_v38 }
  0x9e   : > { %v2523_v44 = vunpack.i.l.bf16 %v3136_v41  ;;  %v476_v46 = vsel %vm475_vm3, %v2528_v43, %v2518_v35  ;;  %v2524_v26 = vunpack.i.h.bf16 %v3136_v41  ;;  %v3198_v35 = vshrl.u32 %v278_v22, 7 }
  0x9f   : > { %797 = vmatprep.subr.bf16.mxu0 %v767_v42  ;;  %v3142_v47 = vpop.permute.xlu1 %2536  ;;  %v478_v40 = vsel %vm475_vm3, %v2519_v34, %v2529_v25 }
  0xa0   : > { %v429_v45 = vsel %vm428_vm2, %v2523_v44, %v2513_v37  ;;  %v2538_v51 = vunpack.i.l.bf16 %v3142_v47  ;;  %v431_v39 = vsel %vm428_vm2, %v2514_v36, %v2524_v26  ;;  %v2539_v41 = vunpack.i.h.bf16 %v3142_v47 }
  0xa1   : > { %v3144_v48 = vpop.permute.xlu0 %2531  ;;  %v766_v49 = vpack.c.bf16 %v476_v46, %v429_v45  ;;  %vm280_vm8 = vcmp.eq.s32.totalorder %v3198_v35, 0  ;;  %v768_v46 = vpack.c.bf16 %v478_v40, %v431_v39 }
  0xa2   : > { %v2534_v52 = vunpack.i.h.bf16 %v3144_v48  ;;  %v2533_v53 = vunpack.i.l.bf16 %v3144_v48  ;;  %vm3221_vm10 = vmpackc.low %vm280_vm8, %vm2949_vm9 }
  0xa3   : > { %798 = vmatpush1.bf16.msra.mxu0 %v766_v49  ;;  %v3154_v57 = vpop.permute.xlu1 %2546 }
  0xa4   : > { %v536_v55 = vsel %vm534_vm4, %v2533_v53, %v2534_v52  ;;  %v535_v56 = vsel %vm534_vm4, %v2538_v51, %v2533_v53  ;;  %v2548_v61 = vunpack.i.l.bf16 %v3154_v57  ;;  %v537_v51 = vsel %vm534_vm4, %v2534_v52, %v2539_v41 }
  0xa5   : > { %v3156_v58 = vpop.permute.xlu0 %2541  ;;  %v773_v59 = vpack.c.bf16 %v536_v55, %v3049_v4  ;;  %v772_v60 = vpack.c.bf16 %v535_v56, %v3047_v3  ;;  %v337_v4 = vsel %vm334_vm0, %v2494_v19, %v2504_v54  ;;  %v2549_v53 = vunpack.i.h.bf16 %v3154_v57 }
  0xa6   : > { %v2543_v62 = vunpack.i.l.bf16 %v3156_v58  ;;  %v385_v1 = vsel %vm381_vm1, %v2509_v50, %v2548_v61  ;;  %v762_v8 = vpack.c.bf16 %v384_v63, %v337_v4  ;;  %v2950_v55 = vmov 1.0   ;;  %v3243_v4 = vld [vmem:[%s3926_s2] sm:$0xf] }
  0xa7   : > { %799 = vmatprep.subr.bf16.mxu0 %v773_v59  ;;  %v3170_v5 = vpop.permute.xlu1 %2556  ;;  %v774_v52 = vpack.c.bf16 %v537_v51, %v3045_v2 }
  0xa8   : > { %800 = vmatpush1.bf16.msra.mxu0 %v772_v60  ;;  %v338_v0 = vsel %vm334_vm0, %v2504_v54, %v2543_v62  ;;  %v2559_v9 = vunpack.i.h.bf16 %v3170_v5  ;;  %v2558_v11 = vunpack.i.l.bf16 %v3170_v5  ;;  %v2544_v54 = vunpack.i.h.bf16 %v3156_v58 }
  0xa9   : > { %v3172_v3 = vpop.permute.xlu0 %2551  ;;  %v763_v7 = vpack.c.bf16 %v385_v1, %v338_v0 }
  0xaa   : > { %v2554_v15 = vunpack.i.h.bf16 %v3172_v3  ;;  %v2553_v16 = vunpack.i.l.bf16 %v3172_v3  ;;  %v630_v18 = vsel %vm628_vm6, %v2558_v11, %v2559_v9 }
  0xab   : > { %836 = vmatprep.subr.bf16.mxu1 %v763_v7  ;;  %v3184_v19 = vpop.permute.xlu1 %2566  ;;  %v339_v7 = vsel %vm334_vm0, %v2543_v62, %v2544_v54 }
  0xac   : > { %837 = vmatpush1.bf16.msra.mxu1 %v762_v8  ;;  %v583_v17 = vsel %vm581_vm5, %v2553_v16, %v2554_v15  ;;  %v2568_v23 = vunpack.i.l.bf16 %v3184_v19  ;;  %v2569_v8 = vunpack.i.h.bf16 %v3184_v19 }
  0xad   : > { %v3186_v20 = vpop.permute.xlu0 %2561  ;;  %v779_v21 = vpack.c.bf16 %v630_v18, %v583_v17 }
  0xae   : > { %v2563_v24 = vunpack.i.l.bf16 %v3186_v20  ;;  %v629_v28 = vsel %vm628_vm6, %v2568_v23, %v2558_v11  ;;  %v2564_v48 = vunpack.i.h.bf16 %v3186_v20  ;;  %v631_v22 = vsel %vm628_vm6, %v2559_v9, %v2569_v8 }
  0xaf   : > { %801 = vmatprep.subr.bf16.mxu0 %v779_v21  ;;  %v3194_v29 = vpop.permute.xlu1 %2576 }
  0xb0   : > { %v582_v27 = vsel %vm581_vm5, %v2563_v24, %v2553_v16  ;;  %v2578_v37 = vunpack.i.l.bf16 %v3194_v29  ;;  %v584_v58 = vsel %vm581_vm5, %v2554_v15, %v2564_v48 }
  0xb1   : > { %v3196_v32 = vpop.permute.xlu0 %2571  ;;  %v778_v33 = vpack.c.bf16 %v629_v28, %v582_v27  ;;  %v780_v24 = vpack.c.bf16 %v631_v22, %v584_v58 }
  0xb2   : > { %v2573_v38 = vunpack.i.l.bf16 %v3196_v32  ;;  %v479_v43 = vsel %vm475_vm3, %v2529_v25, %v2578_v37  ;;  %v2574_v62 = vunpack.i.h.bf16 %v3196_v32 }
  0xb3   : > { %802 = vmatpush1.bf16.msra.mxu0 %v778_v33  ;;  %v3215_v44 = vpop.permute.xlu1 %2586 }
  0xb4   : > { %v432_v42 = vsel %vm428_vm2, %v2524_v26, %v2573_v38  ;;  %v2588_v30 = vunpack.i.l.bf16 %v3215_v44  ;;  %v2589_v19 = vunpack.i.h.bf16 %v3215_v44  ;;  %v433_v26 = vsel %vm428_vm2, %v2573_v38, %v2574_v62 }
  0xb5   : > { %v2582_v31 = vpop.permute.xlu0 %2581  ;;  %v769_v45 = vpack.c.bf16 %v479_v43, %v432_v42 }
  0xb6   : > { %v2584_v34 = vunpack.i.h.bf16 %v2582_v31  ;;  %v2583_v36 = vunpack.i.l.bf16 %v2582_v31 }
  0xb7   : > { %838 = vmatprep.subr.bf16.mxu1 %v769_v45  ;;  %v333_v60 = vpop.permute.xlu1 %332 }
  0xb8   : > { %v676_v47 = vsel %vm675_vm7, %v2588_v30, %v2583_v36  ;;  %v677_v49 = vsel %vm675_vm7, %v2583_v36, %v2584_v34  ;;  %839 = vmatpush1.bf16.msra.mxu1 %v768_v46  ;;  %v340_v2 = vsel %vm334_vm0, %v2544_v54, %v333_v60  ;;  %v678_v27 = vsel %vm675_vm7, %v2584_v34, %v2589_v19 }
  0xb9   : > { %v2385_v56 = vpack.c.bf16 %v2950_v55, %v677_v49  ;;  %v2388_v59 = vpack.c.bf16 %v2950_v55, %v676_v47  ;;  %v529_v63 = vpop.permute.xlu0 %528  ;;  %v2394_v32 = vpack.c.bf16 %v2950_v55, %v678_v27 }
  0xba   : > { %v538_v0 = vsel %vm534_vm4, %v2539_v41, %v529_v63 }
  0xbb   : > { %v775_v1 = vpack.c.bf16 %v538_v0, %v3059_v6  ;;  %2386 = vmatprep.subr.msk.bf16.mxu0 %vm3221_vm10, %v2385_v56  ;;  %v386_v6 = vsel %vm381_vm1, %v2548_v61, %v2549_v53  ;;  %v576_v11 = vpop.permute.xlu1 %575  ;;  %v2579_v61 = vunpack.i.h.bf16 %v3194_v29 }
  0xbc   : > { %2389 = vmatpush1.bf16.msk.msra.mxu0 %vm3221_vm10, %v2388_v59  ;;  %v764_v57 = vpack.c.bf16 %v386_v6, %v339_v7  ;;  %v585_v23 = vsel %vm581_vm5, %v2564_v48, %v576_v11 }
  0xbd   : > { %v380_v16 = vpop.permute.xlu0 %379  ;;  %840 = vmatprep.subr.bf16.mxu1 %v775_v1  ;;  %v480_v25 = vsel %vm475_vm3, %v2578_v37, %v2579_v61 }
  0xbe   : > { %v387_v17 = vsel %vm381_vm1, %v2549_v53, %v380_v16  ;;  %841 = vmatpush1.bf16.msra.mxu1 %v774_v52  ;;  %v770_v37 = vpack.c.bf16 %v480_v25, %v433_v26  ;;  %v935_v16 = vsub.s32 2, %v3198_v35 }
  0xbf   : > { %v765_v18 = vpack.c.bf16 %v387_v17, %v340_v2  ;;  %2365 = vmatmul.mubr.msk.bf16.vlgmr.msra.gmra.mrb[0].mxu0 %vm791_vm11, %v3243_v4  ;;  %v427_v20 = vpop.permute.xlu1 %426  ;;  %v277_v2 = vld [vmem:[%s3925_s1] sm:$0x3f] }
  0xc0   : > { %909 = vmatprep.mubr.bf16.mxu0 %v2946_v12  ;;  %v434_v9 = vsel %vm428_vm2, %v2574_v62, %v427_v20  ;;  %v3310_v17 = vrot.slane %v277_v2, %v935_v16 }
  0xc1   : > { %v623_v21 = vpop.permute.xlu0 %622  ;;  %877 = vmatprep.subr.bf16.mxu0 %v765_v18  ;;  %v927_v18 = vsub.s32 0, %v3198_v35 }
  0xc2   : > { %v632_v3 = vsel %vm628_vm6, %v2569_v8, %v623_v21  ;;  %878 = vmatpush1.bf16.msra.mxu0 %v764_v57  ;;  %v931_v57 = vsub.s32 1, %v3198_v35 }
  0xc3   : > { %v781_v15 = vpack.c.bf16 %v632_v3, %v585_v23  ;;  %v670_v5 = vpop.permute.xlu1 %669 }
  0xc4   : > { %v679_v33 = vsel %vm675_vm7, %v2589_v19, %v670_v5  ;;  %v3319_v22 = vrot.slane %v277_v2, %v931_v57 }
  0xc5   : > { %v474_v28 = vpop.permute.xlu0 %473  ;;  %842 = vmatprep.subr.bf16.mxu1 %v781_v15  ;;  %v2391_v29 = vpack.c.bf16 %v2950_v55, %v679_v33 }
  0xc6   : > { %v481_v39 = vsel %vm475_vm3, %v2579_v61, %v474_v28  ;;  %843 = vmatpush1.bf16.msra.mxu1 %v780_v24  ;;  %v939_v24 = vsub.s32 3, %v3198_v35 }
  0xc7   : > { %v771_v40 = vpack.c.bf16 %v481_v39, %v434_v9  ;;  %v2597_v41 = vpop.permute.xlu1 %2596  ;;  %2392 = vmatprep.subr.msk.bf16.mxu1 %vm3221_vm10, %v2391_v29 }
  0xc8   : > { %v2599_v42 = vunpack.i.h.bf16 %v2597_v41  ;;  %v2598_v31 = vunpack.i.l.bf16 %v2597_v41  ;;  %v3336_v28 = vrot.slane %v277_v2, %v939_v24 }
  0xc9   : > { %v2592_v38 = vpop.permute.xlu0 %2591  ;;  %879 = vmatprep.subr.bf16.mxu0 %v771_v40 }
  0xca   : > { %v2594_v43 = vunpack.i.h.bf16 %v2592_v38  ;;  %v2593_v44 = vunpack.i.l.bf16 %v2592_v38  ;;  %2395 = vmatpush1.bf16.msk.msra.mxu1 %vm3221_vm10, %v2394_v32  ;;  %880 = vmatpush1.bf16.msra.mxu0 %v770_v37  ;;  %v587_v49 = vsel %vm581_vm5, %v2598_v31, %v2599_v42  ;;  %v586_v59 = vsel %vm581_vm5, %v576_v11, %v2598_v31 }
  0xcb   : > { %v2607_v36 = vpop.permute.xlu1 %2606  ;;  %v943_v37 = vsub.s32 4, %v3198_v35  ;;  %v947_v31 = vsub.s32 5, %v3198_v35 }
  0xcc   : > { %v539_v45 = vsel %vm534_vm4, %v529_v63, %v2593_v44  ;;  %v540_v30 = vsel %vm534_vm4, %v2593_v44, %v2594_v43  ;;  %v2609_v51 = vunpack.i.h.bf16 %v2607_v36  ;;  %v2608_v53 = vunpack.i.l.bf16 %v2607_v36 }
  0xcd   : > { %v776_v34 = vpack.c.bf16 %v539_v45, %v3071_v10  ;;  %v2602_v46 = vpop.permute.xlu0 %2601  ;;  %2366 = vmatmul.mubr.msk.bf16.vlgmr.msra.gmra.mrb[0].mxu1 %vm791_vm11, %v3243_v4  ;;  %v777_v47 = vpack.c.bf16 %v540_v30, %v3089_v13  ;;  %v3352_v42 = vrot.slane %v277_v2, %v943_v37  ;;  %v3371_v30 = vrot.slane %v277_v2, %v947_v31 }
  0xce   : > { %v2604_v54 = vunpack.i.h.bf16 %v2602_v46  ;;  %v2603_v56 = vunpack.i.l.bf16 %v2602_v46  ;;  %1479 = vmatprep.mubr.bf16.mxu1 %v2946_v12  ;;  %v681_v10 = vsel %vm675_vm7, %v2608_v53, %v2609_v51  ;;  %v680_v48 = vsel %vm675_vm7, %v670_v5, %v2608_v53 }
  0xcf   : > { %881 = vmatprep.subr.bf16.mxu0 %v777_v47  ;;  %v2397_v13 = vpack.c.bf16 %v2950_v55, %v681_v10  ;;  %v2400_v52 = vpack.c.bf16 %v2950_v55, %v680_v48 }
  0xd0   : > { %v633_v60 = vsel %vm628_vm6, %v623_v21, %v2603_v56  ;;  %882 = vmatpush1.bf16.msra.mxu0 %v776_v34  ;;  %v634_v63 = vsel %vm628_vm6, %v2603_v56, %v2604_v54  ;;  %v3317_v21 = vrot.slane %v277_v2, %v927_v18 }
  0xd1   : > { %v782_v0 = vpack.c.bf16 %v633_v60, %v586_v59  ;;  %v783_v1 = vpack.c.bf16 %v634_v63, %v587_v49 }
  0xd3   : > { %883 = vmatprep.subr.bf16.mxu0 %v783_v1 }
  0xd4   : > { %884 = vmatpush1.bf16.msra.mxu0 %v782_v0 }
  0xd5   : > { %2398 = vmatprep.subr.msk.bf16.mxu0 %vm3221_vm10, %v2397_v13 }
  0xd8   : > { %2401 = vmatpush1.bf16.msk.msra.mxu0 %vm3221_vm10, %v2400_v52 }
  0xdb   : > { %2367 = vmatmul.mubr.msk.bf16.vlgmr.msra.gmra.mrb[4].mxu0 %vm791_vm11, %v3243_v4 }
  0xdc   : > { %1520 = vmatprep.mubr.bf16.mxu0 %v2946_v12 }
 0x192   : > { %v829_v6 = vpop.f32.mrb[0].mxu0 }
 0x193   : > { %v831_v7 = vpop.f32.mrb[1].mxu0  ;;  %v918_v23 = vmax.f32 %v829_v6, 0.0 }
 0x194   : > { %v833_v8 = vpop.f32.mrb[2].mxu0  ;;  %v919_v3 = vmax.f32 %v831_v7, 0.0 }
 0x195   : > { %v834_v11 = vpop.f32.mrb[3].mxu0  ;;  %v3327_v25 = vmul.f32 %v3317_v21, %v918_v23 }
 0x196   : > { %v3330_v26 = vmul.f32 %v3319_v22, %v919_v3 }
 0x198   : > { %v2635_v27 = vpack.i.bf16 %v3330_v26, %v3327_v25 }
 0x1a0   : > { %v870_v58 = vpop.f32.mrb[0].mxu1 }
 0x1a1   : > { %v920_v4 = vmax.f32 %v870_v58, 0.0  ;;  %v872_v61 = vpop.f32.mrb[1].mxu1 }
 0x1a2   : > { %v874_v62 = vpop.f32.mrb[2].mxu1  ;;  %v921_v5 = vmax.f32 %v872_v61, 0.0 }
 0x1a3   : > { %v3315_v19 = vmul.f32 %v3310_v17, %v920_v4  ;;  %v875_v20 = vpop.f32.mrb[3].mxu1 }
 0x1a4   : > { %v3341_v29 = vmul.f32 %v3336_v28, %v921_v5 }
 0x1a5   : > { %v2615_v15 = vpack.i.bf16 %v3315_v19, %v2948_v14  ;;  %v2650_v41 = vpack.i.bf16 %v3315_v19, %v3330_v26 }
 0x1a6   : > { %v2655_v32 = vpack.i.bf16 %v3341_v29, %v3327_v25 }
 0x1a7   : > { %2616 = vrot.lane.b32.xlu1 %v2615_v15, %s2940_s19  ;;  %2611 = vrot.lane.b32.xlu0 %v2615_v15, %s2939_s18 }
 0x1ab   : > { %2626 = vrot.lane.b32.xlu1 %v2615_v15, %s2941_s20  ;;  %2621 = vrot.lane.b32.xlu0 %v2615_v15, %s2942_s21 }
 0x1ae   : > { %v911_v9 = vpop.f32.mrb[4].mxu0 }
 0x1af   : > { %2636 = vrot.lane.b32.xlu1 %v2635_v27, %s2940_s19  ;;  %2631 = vrot.lane.b32.xlu0 %v2635_v27, %s2939_s18  ;;  %v913_v33 = vpop.f32.mrb[5].mxu0  ;;  %v922_v38 = vmax.f32 %v911_v9, 0.0 }
 0x1b0   : > { %v915_v39 = vpop.f32.mrb[6].mxu0  ;;  %v923_v45 = vmax.f32 %v913_v33, 0.0 }
 0x1b1   : > { %v916_v40 = vpop.f32.mrb[7].mxu0  ;;  %v3357_v43 = vmul.f32 %v3352_v42, %v922_v38 }
 0x1b2   : > { %v3377_v34 = vmul.f32 %v3371_v30, %v923_v45 }
 0x1b3   : > { %2646 = vrot.lane.b32.xlu1 %v2635_v27, %s2941_s20  ;;  %2641 = vrot.lane.b32.xlu0 %v2635_v27, %s2942_s21  ;;  %v2690_v44 = vpack.i.bf16 %v3357_v43, %v3341_v29 }
 0x1b4   : > { %v2710_v35 = vpack.i.bf16 %v2948_v14, %v3377_v34 }
 0x1b7   : > { %2656 = vrot.lane.b32.xlu1 %v2655_v32, %s2943_s22  ;;  %2651 = vrot.lane.b32.xlu0 %v2650_v41, %s2943_s22 }
 0x1bb   : > { %2666 = vrot.lane.b32.xlu1 %v2650_v41, %s2944_s23  ;;  %2661 = vrot.lane.b32.xlu0 %v2650_v41, %s2945_s29 }
 0x1bf   : > { %2676 = vrot.lane.b32.xlu1 %v2655_v32, %s2944_s23  ;;  %2671 = vrot.lane.b32.xlu0 %v2655_v32, %s2945_s29 }
 0x1c3   : > { %2681 = vrot.lane.b32.xlu0 %v2650_v41, %s2947_s8  ;;  %2691 = vrot.lane.b32.xlu1 %v2690_v44, %s2939_s18 }
 0x1c7   : > { %2686 = vrot.lane.b32.xlu0 %v2655_v32, %s2947_s8  ;;  %2706 = vrot.lane.b32.xlu1 %v2690_v44, %s2941_s20 }
 0x1cb   : > { %2696 = vrot.lane.b32.xlu0 %v2690_v44, %s2940_s19  ;;  %1185 = vrot.lane.b32.xlu1 %v3357_v43, %s2943_s22 }
 0x1cf   : > { %2701 = vrot.lane.b32.xlu0 %v2690_v44, %s2942_s21  ;;  %1231 = vrot.lane.b32.xlu1 %v3357_v43, %s2945_s29 }
 0x1d3   : > { %1277 = vrot.lane.b32.xlu0 %v3357_v43, %s2944_s23  ;;  %993 = vrot.lane.b32.xlu1 %v3377_v34, %s2939_s18 }
 0x1d7   : > { %1039 = vrot.lane.b32.xlu0 %v3377_v34, %s2940_s19  ;;  %1085 = vrot.lane.b32.xlu1 %v3377_v34, %s2942_s21 }
 0x1db   : > { %1131 = vrot.lane.b32.xlu0 %v3377_v34, %s2941_s20  ;;  %1323 = vrot.lane.b32.xlu1 %v3357_v43, %s2947_s8 }
 0x1df   : > { %2711 = vrot.lane.b32.xlu0 %v2710_v35, %s2943_s22  ;;  %2716 = vrot.lane.b32.xlu1 %v2710_v35, %s2945_s29 }
 0x1e3   : > { %2721 = vrot.lane.b32.xlu0 %v2710_v35, %s2944_s23  ;;  %2726 = vrot.lane.b32.xlu1 %v2710_v35, %s2947_s8 }
 0x1e7   : > { %1840 = vrot.lane.b32.xlu1 %v2948_v14, %s2943_s22 }
 0x219   : > { %v3399_v36 = vpop.permute.xlu1 %2616  ;;  %v3401_v46 = vpop.permute.xlu0 %2611 }
 0x21a   : > { %v2618_v51 = vunpack.i.l.bf16 %v3399_v36  ;;  %v2613_v53 = vunpack.i.l.bf16 %v3401_v46 }
 0x21d   : > { %v3403_v47 = vpop.permute.xlu1 %2626  ;;  %v3405_v49 = vpop.permute.xlu0 %2621 }
 0x21e   : > { %v2628_v13 = vunpack.i.l.bf16 %v3403_v47  ;;  %v2623_v48 = vunpack.i.l.bf16 %v3405_v49 }
 0x221   : > { %v3409_v54 = vpop.permute.xlu1 %2636  ;;  %v3411_v56 = vpop.permute.xlu0 %2631 }
 0x222   : > { %v2639_v59 = vunpack.i.h.bf16 %v3409_v54  ;;  %v2638_v10 = vunpack.i.l.bf16 %v3409_v54  ;;  %v2634_v60 = vunpack.i.h.bf16 %v3411_v56  ;;  %v2633_v63 = vunpack.i.l.bf16 %v3411_v56 }
 0x223   : > { %v2629_v56 = vunpack.i.h.bf16 %v3403_v47 }
 0x224   : > { %v1041_v0 = vsel %vm381_vm1, %v2618_v51, %v2638_v10  ;;  %v995_v1 = vsel %vm334_vm0, %v2613_v53, %v2633_v63  ;;  %v996_v8 = vsel %vm334_vm0, %v2633_v63, %v2634_v60  ;;  %v1042_v11 = vsel %vm381_vm1, %v2638_v10, %v2639_v59 }
 0x225   : > { %v1413_v52 = vpack.c.bf16 %v1041_v0, %v995_v1  ;;  %v3421_v6 = vpop.permute.xlu1 %2646  ;;  %v3423_v7 = vpop.permute.xlu0 %2641  ;;  %v1414_v58 = vpack.c.bf16 %v1042_v11, %v996_v8 }
 0x226   : > { %v2649_v16 = vunpack.i.h.bf16 %v3421_v6  ;;  %v2648_v2 = vunpack.i.l.bf16 %v3421_v6  ;;  %v2644_v18 = vunpack.i.h.bf16 %v3423_v7  ;;  %v2643_v57 = vunpack.i.l.bf16 %v3423_v7 }
 0x227   : > { %1447 = vmatprep.subr.bf16.mxu1 %v1414_v58 }
 0x228   : > { %v1133_v4 = vsel %vm475_vm3, %v2628_v13, %v2648_v2  ;;  %v1087_v61 = vsel %vm428_vm2, %v2623_v48, %v2643_v57  ;;  %v1088_v23 = vsel %vm428_vm2, %v2643_v57, %v2644_v18  ;;  %v1134_v3 = vsel %vm475_vm3, %v2648_v2, %v2649_v16  ;;  %1448 = vmatpush1.bf16.msra.mxu1 %v1413_v52 }
 0x229   : > { %v3437_v62 = vpop.permute.xlu1 %2656  ;;  %v3439_v20 = vpop.permute.xlu0 %2651  ;;  %v1419_v15 = vpack.c.bf16 %v1133_v4, %v1087_v61  ;;  %v1420_v9 = vpack.c.bf16 %v1134_v3, %v1088_v23 }
 0x22a   : > { %v2658_v24 = vunpack.i.l.bf16 %v3437_v62  ;;  %v2654_v27 = vunpack.i.h.bf16 %v3439_v20  ;;  %v2653_v5 = vunpack.i.l.bf16 %v3439_v20 }
 0x22b   : > { %1449 = vmatprep.subr.bf16.mxu1 %v1420_v9 }
 0x22c   : > { %v1191_v33 = vsel %vm534_vm4, %v2658_v24, %v2653_v5  ;;  %v1192_v39 = vsel %vm534_vm4, %v2653_v5, %v2654_v27  ;;  %1450 = vmatpush1.bf16.msra.mxu1 %v1419_v15  ;;  %v2619_v15 = vunpack.i.h.bf16 %v3399_v36  ;;  %v2614_v24 = vunpack.i.h.bf16 %v3401_v46  ;;  %v3513_v36 = vld [vmem:[%s3927_s3] sm:$0xf] }
 0x22d   : > { %v1425_v40 = vpack.c.bf16 %v1191_v33, %v3327_v25  ;;  %v3455_v37 = vpop.permute.xlu1 %2666  ;;  %v3457_v32 = vpop.permute.xlu0 %2661  ;;  %v1426_v41 = vpack.c.bf16 %v1192_v39, %v3330_v26  ;;  %v2659_v46 = vunpack.i.h.bf16 %v3437_v62  ;;  %v1135_v62 = vsel %vm475_vm3, %v2649_v16, %v2629_v56 }
 0x22e   : > { %v2669_v38 = vunpack.i.h.bf16 %v3455_v37  ;;  %v2668_v44 = vunpack.i.l.bf16 %v3455_v37  ;;  %v2664_v31 = vunpack.i.h.bf16 %v3457_v32  ;;  %v2663_v45 = vunpack.i.l.bf16 %v3457_v32 }
 0x22f   : > { %1451 = vmatprep.subr.bf16.mxu1 %v1426_v41  ;;  %v997_v41 = vsel %vm334_vm0, %v2634_v60, %v2614_v24  ;;  %v2624_v60 = vunpack.i.h.bf16 %v3405_v49  ;;  %v1193_v47 = vsel %vm534_vm4, %v2654_v27, %v2659_v46 }
 0x230   : > { %v1238_v25 = vsel %vm581_vm5, %v2663_v45, %v2664_v31  ;;  %v1284_v35 = vsel %vm628_vm6, %v2668_v44, %v2669_v38  ;;  %1452 = vmatpush1.bf16.msra.mxu1 %v1425_v40  ;;  %v1043_v40 = vsel %vm381_vm1, %v2639_v59, %v2619_v15 }
 0x231   : > { %v3470_v51 = vpop.permute.xlu1 %2676  ;;  %v3472_v26 = vpop.permute.xlu0 %2671  ;;  %v1432_v53 = vpack.c.bf16 %v1284_v35, %v1238_v25 }
 0x232   : > { %v2678_v10 = vunpack.i.l.bf16 %v3470_v51  ;;  %v2673_v63 = vunpack.i.l.bf16 %v3472_v26  ;;  %v2679_v16 = vunpack.i.h.bf16 %v3470_v51  ;;  %v2674_v7 = vunpack.i.h.bf16 %v3472_v26 }
 0x233   : > { %1453 = vmatprep.subr.bf16.mxu1 %v1432_v53  ;;  %v1415_v53 = vpack.c.bf16 %v1043_v40, %v997_v41 }
 0x234   : > { %v1283_v13 = vsel %vm628_vm6, %v2678_v10, %v2668_v44  ;;  %v1237_v0 = vsel %vm581_vm5, %v2673_v63, %v2663_v45  ;;  %v1089_v63 = vsel %vm428_vm2, %v2644_v18, %v2624_v60  ;;  %v1285_v51 = vsel %vm628_vm6, %v2669_v38, %v2679_v16 }
 0x235   : > { %v1431_v1 = vpack.c.bf16 %v1283_v13, %v1237_v0  ;;  %v3478_v48 = vpop.permute.xlu0 %2681  ;;  %v3480_v52 = vpop.permute.xlu1 %2691  ;;  %v1421_v20 = vpack.c.bf16 %v1135_v62, %v1089_v63  ;;  %v1239_v26 = vsel %vm581_vm5, %v2664_v31, %v2674_v7 }
 0x236   : > { %v2684_v8 = vunpack.i.h.bf16 %v3478_v48  ;;  %v2683_v11 = vunpack.i.l.bf16 %v3478_v48  ;;  %v2693_v23 = vunpack.i.l.bf16 %v3480_v52  ;;  %v2694_v27 = vunpack.i.h.bf16 %v3480_v52 }
 0x237   : > { %1454 = vmatpush1.bf16.msra.mxu1 %v1431_v1 }
 0x238   : > { %v1330_v2 = vsel %vm675_vm7, %v2683_v11, %v2684_v8  ;;  %v998_v54 = vsel %vm334_vm0, %v2614_v24, %v2693_v23 }
 0x239   : > { %v2403_v57 = vpack.c.bf16 %v2950_v55, %v1330_v2  ;;  %v3488_v58 = vpop.permute.xlu0 %2686  ;;  %v3490_v4 = vpop.permute.xlu1 %2706 }
 0x23a   : > { %v2688_v61 = vunpack.i.l.bf16 %v3488_v58  ;;  %v2708_v44 = vunpack.i.l.bf16 %v3490_v4  ;;  %v2689_v38 = vunpack.i.h.bf16 %v3488_v58  ;;  %v2709_v32 = vunpack.i.h.bf16 %v3490_v4 }
 0x23b   : > { %2404 = vmatprep.subr.msk.bf16.mxu1 %vm3221_vm10, %v2403_v57  ;;  %v1427_v57 = vpack.c.bf16 %v1193_v47, %v3315_v19  ;;  %v999_v19 = vsel %vm334_vm0, %v2693_v23, %v2694_v27 }
 0x23c   : > { %v1329_v3 = vsel %vm675_vm7, %v2688_v61, %v2683_v11  ;;  %v1136_v6 = vsel %vm475_vm3, %v2629_v56, %v2708_v44  ;;  %v1331_v58 = vsel %vm675_vm7, %v2684_v8, %v2689_v38  ;;  %v1137_v4 = vsel %vm475_vm3, %v2708_v44, %v2709_v32 }
 0x23d   : > { %v2406_v5 = vpack.c.bf16 %v2950_v55, %v1329_v3  ;;  %v2697_v9 = vpop.permute.xlu0 %2696  ;;  %v3500_v33 = vpop.permute.xlu1 %1185  ;;  %v2412_v62 = vpack.c.bf16 %v2950_v55, %v1331_v58 }
 0x23e   : > { %v2698_v39 = vunpack.i.l.bf16 %v2697_v9  ;;  %v1194_v49 = vsel %vm534_vm4, %v2659_v46, %v3500_v33  ;;  %v2699_v18 = vunpack.i.h.bf16 %v2697_v9  ;;  %v1433_v46 = vpack.c.bf16 %v1285_v51, %v1239_v26 }
 0x23f   : > { %2407 = vmatpush1.bf16.msk.msra.mxu1 %vm3221_vm10, %v2406_v5  ;;  %v1428_v2 = vpack.c.bf16 %v1194_v49, %v3341_v29 }
 0x240   : > { %v1044_v59 = vsel %vm381_vm1, %v2619_v15, %v2698_v39  ;;  %v1045_v3 = vsel %vm381_vm1, %v2698_v39, %v2699_v18 }
 0x241   : > { %v2702_v45 = vpop.permute.xlu0 %2701  ;;  %v3521_v25 = vpop.permute.xlu1 %1231  ;;  %v1416_v35 = vpack.c.bf16 %v1044_v59, %v998_v54  ;;  %v1417_v39 = vpack.c.bf16 %v1045_v3, %v999_v19 }
 0x242   : > { %v2703_v10 = vunpack.i.l.bf16 %v2702_v45  ;;  %2368 = vmatmul.mubr.msk.bf16.vlgmr.msra.gmra.mrb[4].mxu1 %vm791_vm11, %v3513_v36  ;;  %v2704_v52 = vunpack.i.h.bf16 %v2702_v45  ;;  %v1240_v24 = vsel %vm581_vm5, %v2674_v7, %v3521_v25 }
 0x243   : > { %1488 = vmatprep.subr.bf16.mxu0 %v1416_v35  ;;  %1561 = vmatprep.mubr.bf16.mxu1 %v2946_v12 }
 0x244   : > { %1489 = vmatpush1.bf16.msra.mxu0 %v1415_v53  ;;  %v1090_v13 = vsel %vm428_vm2, %v2624_v60, %v2703_v10  ;;  %v1091_v40 = vsel %vm428_vm2, %v2703_v10, %v2704_v52 }
 0x245   : > { %v3541_v0 = vpop.permute.xlu0 %1277  ;;  %v994_v1 = vpop.permute.xlu1 %993  ;;  %v1422_v11 = vpack.c.bf16 %v1136_v6, %v1090_v13  ;;  %v1423_v35 = vpack.c.bf16 %v1137_v4, %v1091_v40 }
 0x246   : > { %v1286_v61 = vsel %vm628_vm6, %v2679_v16, %v3541_v0  ;;  %v1000_v5 = vsel %vm334_vm0, %v2694_v27, %v994_v1 }
 0x247   : > { %1490 = vmatprep.subr.bf16.mxu0 %v1422_v11  ;;  %v1434_v31 = vpack.c.bf16 %v1286_v61, %v1240_v24 }
 0x248   : > { %1491 = vmatpush1.bf16.msra.mxu0 %v1421_v20 }
 0x249   : > { %1492 = vmatprep.subr.bf16.mxu0 %v1428_v2  ;;  %v1040_v29 = vpop.permute.xlu0 %1039  ;;  %v1086_v15 = vpop.permute.xlu1 %1085 }
 0x24a   : > { %v1046_v37 = vsel %vm381_vm1, %v2699_v18, %v1040_v29  ;;  %v1092_v54 = vsel %vm428_vm2, %v2704_v52, %v1086_v15 }
 0x24b   : > { %v1418_v9 = vpack.c.bf16 %v1046_v37, %v1000_v5 }
 0x24c   : > { %1493 = vmatpush1.bf16.msra.mxu0 %v1427_v57 }
 0x24d   : > { %1494 = vmatprep.subr.bf16.mxu0 %v1434_v31  ;;  %v1132_v41 = vpop.permute.xlu0 %1131  ;;  %1529 = vmatprep.subr.bf16.mxu1 %v1418_v9  ;;  %v1324_v23 = vpop.permute.xlu1 %1323 }
 0x24e   : > { %v1138_v59 = vsel %vm475_vm3, %v2709_v32, %v1132_v41  ;;  %v1332_v56 = vsel %vm675_vm7, %v2689_v38, %v1324_v23  ;;  %1530 = vmatpush1.bf16.msra.mxu1 %v1417_v39 }
 0x24f   : > { %v1424_v60 = vpack.c.bf16 %v1138_v59, %v1092_v54  ;;  %v2409_v45 = vpack.c.bf16 %v2950_v55, %v1332_v56 }
 0x250   : > { %1495 = vmatpush1.bf16.msra.mxu0 %v1433_v46 }
 0x251   : > { %v2712_v53 = vpop.permute.xlu0 %2711  ;;  %2410 = vmatprep.subr.msk.bf16.mxu0 %vm3221_vm10, %v2409_v45  ;;  %1531 = vmatprep.subr.bf16.mxu1 %v1424_v60  ;;  %v2717_v10 = vpop.permute.xlu1 %2716 }
 0x252   : > { %v2714_v63 = vunpack.i.h.bf16 %v2712_v53  ;;  %v2713_v47 = vunpack.i.l.bf16 %v2712_v53  ;;  %1532 = vmatpush1.bf16.msra.mxu1 %v1423_v35  ;;  %v2718_v48 = vunpack.i.l.bf16 %v2717_v10  ;;  %v2719_v44 = vunpack.i.h.bf16 %v2717_v10 }
 0x254   : > { %v1195_v8 = vsel %vm534_vm4, %v3500_v33, %v2713_v47  ;;  %2413 = vmatpush1.bf16.msk.msra.mxu0 %vm3221_vm10, %v2412_v62  ;;  %v1196_v49 = vsel %vm534_vm4, %v2713_v47, %v2714_v63  ;;  %v1241_v27 = vsel %vm581_vm5, %v3521_v25, %v2718_v48  ;;  %v1242_v2 = vsel %vm581_vm5, %v2718_v48, %v2719_v44 }
 0x255   : > { %v1429_v13 = vpack.c.bf16 %v1195_v8, %v3357_v43  ;;  %v2722_v6 = vpop.permute.xlu0 %2721  ;;  %v2727_v16 = vpop.permute.xlu1 %2726  ;;  %v1430_v7 = vpack.c.bf16 %v1196_v49, %v3377_v34 }
 0x256   : > { %v2724_v18 = vunpack.i.h.bf16 %v2722_v6  ;;  %v2723_v1 = vunpack.i.l.bf16 %v2722_v6  ;;  %v2729_v11 = vunpack.i.h.bf16 %v2727_v16  ;;  %v2728_v20 = vunpack.i.l.bf16 %v2727_v16 }
 0x257   : > { %2369 = vmatmul.mubr.msk.bf16.vlgmr.msra.gmra.mrb[8].mxu0 %vm791_vm11, %v3513_v36  ;;  %1533 = vmatprep.subr.bf16.mxu1 %v1430_v7 }
 0x258   : > { %v1287_v33 = vsel %vm628_vm6, %v3541_v0, %v2723_v1  ;;  %v1334_v43 = vsel %vm675_vm7, %v2728_v20, %v2729_v11  ;;  %1534 = vmatpush1.bf16.msra.mxu1 %v1429_v13  ;;  %v1288_v34 = vsel %vm628_vm6, %v2723_v1, %v2724_v18  ;;  %2136 = vmatprep.mubr.bf16.mxu0 %v2946_v12 }
 0x259   : > { %v1435_v57 = vpack.c.bf16 %v1287_v33, %v1241_v27  ;;  %v1436_v61 = vpack.c.bf16 %v1288_v34, %v1242_v2  ;;  %v1333_v25 = vsel %vm675_vm7, %v1324_v23, %v2728_v20  ;;  %v2415_v51 = vpack.c.bf16 %v2950_v55, %v1334_v43 }
 0x25a   : > { %v2418_v0 = vpack.c.bf16 %v2950_v55, %v1333_v25 }
 0x25b   : > { %1535 = vmatprep.subr.bf16.mxu1 %v1436_v61 }
 0x25c   : > { %1536 = vmatpush1.bf16.msra.mxu1 %v1435_v57  ;;  %v3671_v57 = vpop.permute.xlu1 %1840 }
 0x25d   : > { %2416 = vmatprep.subr.msk.bf16.mxu1 %vm3221_vm10, %v2415_v51 }
 0x260   : > { %2419 = vmatpush1.bf16.msk.msra.mxu1 %vm3221_vm10, %v2418_v0 }
 0x263   : > { %2370 = vmatmul.mubr.msk.bf16.vlgmr.msra.gmra.mrb[8].mxu1 %vm791_vm11, %v3513_v36 }
 0x264   : > { %2179 = vmatprep.mubr.bf16.mxu1 %v2946_v12 }
 0x315   : > { %v1481_v26 = vpop.f32.mrb[4].mxu1 }
 0x316   : > { %v2371_v3 = vmul.f32 -1.442695, %v1481_v26  ;;  %v1483_v52 = vpop.f32.mrb[5].mxu1 }
 0x317   : > { %v2372_v29 = vmul.f32 -1.442695, %v1483_v52  ;;  %v1485_v15 = vpop.f32.mrb[6].mxu1 }
 0x318   : > { %2851 = vpow2.f32 %v2371_v3  ;;  %v1486_v19 = vpop.f32.mrb[7].mxu1 }
 0x319   : > { %2853 = vpow2.f32 %v2372_v29 }
 0x322   : > { %v2852_v24 = vpop.eup %2851 }
 0x323   : > { %v2854_v5 = vpop.eup %2853  ;;  %v1588_v37 = vadd.f32 1.0, %v2852_v24 }
 0x324   : > { %v1589_v38 = vadd.f32 1.0, %v2854_v5 }
 0x325   : > { %2855 = vrcp.f32 %v1588_v37 }
 0x326   : > { %2857 = vrcp.f32 %v1589_v38 }
 0x32a   : > { %v1522_v32 = vpop.f32.mrb[8].mxu0 }
 0x32b   : > { %v2373_v31 = vmul.f32 -1.442695, %v1522_v32  ;;  %v1524_v9 = vpop.f32.mrb[9].mxu0 }
 0x32c   : > { %v1526_v36 = vpop.f32.mrb[10].mxu0  ;;  %v2374_v39 = vmul.f32 -1.442695, %v1524_v9 }
 0x32d   : > { %2859 = vpow2.f32 %v2373_v31  ;;  %v1527_v40 = vpop.f32.mrb[11].mxu0 }
 0x32e   : > { %2861 = vpow2.f32 %v2374_v39 }
 0x32f   : > { %v2856_v41 = vpop.eup %2855 }
 0x330   : > { %v2858_v23 = vpop.eup %2857  ;;  %v3602_v46 = vmul.f32 %v2856_v41, %v3317_v21 }
 0x331   : > { %v3605_v54 = vmul.f32 %v2858_v23, %v3319_v22 }
 0x332   : > { %1920 = vrot.lane.b32.xlu1 %v3602_v46, %s2944_s23 }
 0x333   : > { %v2730_v59 = vpack.i.bf16 %v3605_v54, %v3602_v46 }
 0x335   : > { %2731 = vrot.lane.b32.xlu0 %v2730_v59, %s2939_s18 }
 0x336   : > { %v1563_v56 = vpop.f32.mrb[8].mxu1  ;;  %1966 = vrot.lane.b32.xlu1 %v3602_v46, %s2947_s8 }
 0x337   : > { %v2860_v58 = vpop.eup %2859  ;;  %v2375_v4 = vmul.f32 -1.442695, %v1563_v56  ;;  %v1565_v60 = vpop.f32.mrb[9].mxu1 }
 0x338   : > { %v1590_v45 = vadd.f32 1.0, %v2860_v58  ;;  %v1567_v35 = vpop.f32.mrb[10].mxu1  ;;  %v2862_v10 = vpop.eup %2861  ;;  %v2376_v62 = vmul.f32 -1.442695, %v1565_v60 }
 0x339   : > { %2863 = vpow2.f32 %v2375_v4  ;;  %2741 = vrot.lane.b32.xlu0 %v2730_v59, %s2942_s21  ;;  %v1568_v53 = vpop.f32.mrb[11].mxu1  ;;  %v1591_v63 = vadd.f32 1.0, %v2862_v10 }
 0x33a   : > { %2865 = vrcp.f32 %v1590_v45  ;;  %2736 = vrot.lane.b32.xlu1 %v2730_v59, %s2940_s19 }
 0x33b   : > { %2867 = vpow2.f32 %v2376_v62 }
 0x33c   : > { %2869 = vrcp.f32 %v1591_v63 }
 0x33e   : > { %2746 = vrot.lane.b32.xlu1 %v2730_v59, %s2941_s20 }
 0x343   : > { %v2864_v47 = vpop.eup %2863 }
 0x344   : > { %v2866_v48 = vpop.eup %2865  ;;  %v1592_v8 = vadd.f32 1.0, %v2864_v47 }
 0x345   : > { %v3618_v44 = vmul.f32 %v2866_v48, %v3310_v17  ;;  %v2868_v13 = vpop.eup %2867 }
 0x346   : > { %2871 = vrcp.f32 %v1592_v8  ;;  %v2870_v6 = vpop.eup %2869  ;;  %v1593_v16 = vadd.f32 1.0, %v2868_v13 }
 0x347   : > { %v2755_v49 = vpack.i.bf16 %v3618_v44, %v2948_v14  ;;  %v3627_v7 = vmul.f32 %v2870_v6, %v3336_v28  ;;  %v2780_v18 = vpack.i.bf16 %v3618_v44, %v3605_v54 }
 0x348   : > { %2873 = vrcp.f32 %v1593_v16 }
 0x349   : > { %2756 = vrot.lane.b32.xlu1 %v2755_v49, %s2940_s19  ;;  %2751 = vrot.lane.b32.xlu0 %v2755_v49, %s2939_s18  ;;  %v2790_v20 = vpack.i.bf16 %v3627_v7, %v3602_v46 }
 0x34d   : > { %2766 = vrot.lane.b32.xlu1 %v2755_v49, %s2941_s20  ;;  %2761 = vrot.lane.b32.xlu0 %v2755_v49, %s2942_s21 }
 0x350   : > { %v2872_v1 = vpop.eup %2871 }
 0x351   : > { %2781 = vrot.lane.b32.xlu1 %v2780_v18, %s2944_s23  ;;  %2771 = vrot.lane.b32.xlu0 %v2780_v18, %s2943_s22  ;;  %v3634_v11 = vmul.f32 %v2872_v1, %v3352_v42 }
 0x352   : > { %v2874_v33 = vpop.eup %2873 }
 0x353   : > { %v2805_v27 = vpack.i.bf16 %v3634_v11, %v3627_v7  ;;  %v3647_v43 = vmul.f32 %v2874_v33, %v3371_v30 }
 0x355   : > { %2776 = vrot.lane.b32.xlu0 %v2780_v18, %s2945_s29  ;;  %2791 = vrot.lane.b32.xlu1 %v2790_v20, %s2943_s22  ;;  %v2840_v2 = vpack.i.bf16 %v2948_v14, %v3647_v43  ;;  %v2825_v34 = vpack.i.bf16 %v3647_v43, %v3634_v11 }
 0x359   : > { %2786 = vrot.lane.b32.xlu0 %v2780_v18, %s2947_s8  ;;  %2806 = vrot.lane.b32.xlu1 %v2805_v27, %s2940_s19 }
 0x35d   : > { %2796 = vrot.lane.b32.xlu0 %v2790_v20, %s2945_s29  ;;  %2816 = vrot.lane.b32.xlu1 %v2805_v27, %s2941_s20 }
 0x361   : > { %2801 = vrot.lane.b32.xlu0 %v2805_v27, %s2939_s18  ;;  %1690 = vrot.lane.b32.xlu1 %v3647_v43, %s2940_s19 }
 0x365   : > { %2811 = vrot.lane.b32.xlu0 %v2805_v27, %s2942_s21  ;;  %1782 = vrot.lane.b32.xlu1 %v3647_v43, %s2941_s20 }
 0x369   : > { %1644 = vrot.lane.b32.xlu0 %v3647_v43, %s2939_s18  ;;  %2821 = vrot.lane.b32.xlu1 %v2805_v27, %s2944_s23  ;;  %s3882_s18 = scalar_lea.hbm %s3931_s7, %s2381_s13 }
 0x36d   : > { %1736 = vrot.lane.b32.xlu0 %v3647_v43, %s2942_s21  ;;  %2841 = vrot.lane.b32.xlu1 %v2840_v2, %s2944_s23  ;;  %s2879_s21 = sshll.u32 %s2951_s28, 4  ;;  %s2880_s21 = int_to_ptr.vmem [resolvable:$false] %s2879_s21 }
 0x371   : > { %1886 = vrot.lane.b32.xlu0 %v2948_v14, %s2945_s29  ;;  %2846 = vrot.lane.b32.xlu1 %v2840_v2, %s2947_s8 }
 0x375   : > { %2826 = vrot.lane.b32.xlu0 %v2825_v34, %s2943_s22  ;;  %s2881_s22 = scalar_lea.vmem %s2880_s21, 32 }
 0x379   : > { %2831 = vrot.lane.b32.xlu0 %v2825_v34, %s2945_s29  ;;  %s269_s29 = sand.u32 1, %s2929_s25  }
 0x37a   : > { %s270_s14 = scalar_lea.vmem [#allocation4], %s269_s29  ;;  %s2292_s19 = scalar_lea.sflag [#allocation5], %s269_s29 }
 0x37b   : > { %s2304_s15 = sshll.u32 %s270_s14, 4  ;;  %s3884_s15 = int_to_ptr.vmem [resolvable:$true] %s2304_s15 }
 0x37c   : > { %s2875_s20 = scalar_lea.vmem %s3884_s15, 16  ;;  %p2882_p0 = scmp.lt.s32.totalorder %s3884_s15, %s2880_s21 }
 0x37d   : > { %2836 = vrot.lane.b32.xlu0 %v2805_v27, %s2947_s8  ;;  %p2876_p11 = scmp.ne.s32.totalorder %s3884_s15, %s2875_s20  ;;  %p2883_p1 = scmp.lt.s32.totalorder %s2881_s22, %s2875_s20 }
 0x37f   : > { %p2877_p12 = pnand %p2876_p11, %p3030_p5  ;;  %p2884_p2 = por %p2883_p1, %p2882_p0 }
 0x381   : > { %p2878_p13 = pneg %p2877_p12 }
 0x383   : > { %p2885_p3 = pnand %p2884_p2, %p2878_p13 }
 0x3a4   : > { %v3673_v61 = vpop.permute.xlu1 %1920 }
 0x3a7   : > { %v3677_v51 = vpop.permute.xlu0 %2731 }
 0x3a8   : > { %v3675_v25 = vpop.permute.xlu1 %1966  ;;  %v2734_v14 = vunpack.i.h.bf16 %v3677_v51  ;;  %v2733_v0 = vunpack.i.l.bf16 %v3677_v51 }
 0x3aa   : > { %v1647_v29 = vsel %vm334_vm0, %v2733_v0, %v2734_v14 }
 0x3ab   : > { %v3691_v24 = vpop.permute.xlu0 %2741 }
 0x3ac   : > { %v3681_v26 = vpop.permute.xlu1 %2736  ;;  %v2744_v37 = vunpack.i.h.bf16 %v3691_v24  ;;  %v2743_v38 = vunpack.i.l.bf16 %v3691_v24 }
 0x3ad   : > { %v2739_v3 = vunpack.i.h.bf16 %v3681_v26  ;;  %v2738_v52 = vunpack.i.l.bf16 %v3681_v26 }
 0x3ae   : > { %v1739_v41 = vsel %vm428_vm2, %v2743_v38, %v2744_v37 }
 0x3af   : > { %v1693_v15 = vsel %vm381_vm1, %v2738_v52, %v2739_v3 }
 0x3b0   : > { %v2065_v19 = vpack.c.bf16 %v1693_v15, %v1647_v29  ;;  %v3693_v5 = vpop.permute.xlu1 %2746 }
 0x3b1   : > { %v2749_v32 = vunpack.i.h.bf16 %v3693_v5  ;;  %v2748_v31 = vunpack.i.l.bf16 %v3693_v5 }
 0x3b2   : > { %2104 = vmatprep.subr.bf16.mxu0 %v2065_v19 }
 0x3b3   : > { %v1785_v23 = vsel %vm475_vm3, %v2748_v31, %v2749_v32 }
 0x3b4   : > { %v2071_v53 = vpack.c.bf16 %v1785_v23, %v1739_v41 }
 0x3bb   : > { %v3699_v9 = vpop.permute.xlu1 %2756  ;;  %v3701_v36 = vpop.permute.xlu0 %2751 }
 0x3bc   : > { %v2758_v39 = vunpack.i.l.bf16 %v3699_v9  ;;  %v2753_v40 = vunpack.i.l.bf16 %v3701_v36  ;;  %v2759_v23 = vunpack.i.h.bf16 %v3699_v9 }
 0x3be   : > { %v1692_v59 = vsel %vm381_vm1, %v2758_v39, %v2738_v52  ;;  %v1646_v56 = vsel %vm334_vm0, %v2753_v40, %v2733_v0 }
 0x3bf   : > { %v2064_v58 = vpack.c.bf16 %v1692_v59, %v1646_v56  ;;  %v3713_v4 = vpop.permute.xlu1 %2766  ;;  %v3715_v60 = vpop.permute.xlu0 %2761 }
 0x3c0   : > { %v2768_v45 = vunpack.i.l.bf16 %v3713_v4  ;;  %v2763_v35 = vunpack.i.l.bf16 %v3715_v60 }
 0x3c1   : > { %2105 = vmatpush1.bf16.msra.mxu0 %v2064_v58 }
 0x3c2   : > { %v1784_v10 = vsel %vm475_vm3, %v2768_v45, %v2748_v31  ;;  %v1738_v62 = vsel %vm428_vm2, %v2763_v35, %v2743_v38  ;;  %2106 = vmatprep.subr.bf16.mxu0 %v2071_v53 }
 0x3c3   : > { %v2070_v63 = vpack.c.bf16 %v1784_v10, %v1738_v62  ;;  %v3721_v47 = vpop.permute.xlu1 %2781  ;;  %v3723_v48 = vpop.permute.xlu0 %2771 }
 0x3c4   : > { %v2774_v8 = vunpack.i.h.bf16 %v3723_v48  ;;  %v2773_v49 = vunpack.i.l.bf16 %v3723_v48  ;;  %v2784_v13 = vunpack.i.h.bf16 %v3721_v47  ;;  %v2783_v6 = vunpack.i.l.bf16 %v3721_v47 }
 0x3c5   : > { %2107 = vmatpush1.bf16.msra.mxu0 %v2070_v63 }
 0x3c6   : > { %v1843_v16 = vsel %vm534_vm4, %v2773_v49, %v2774_v8  ;;  %v1935_v52 = vsel %vm628_vm6, %v2783_v6, %v2784_v13  ;;  %v1934_v56 = vsel %vm628_vm6, %v3673_v61, %v2783_v6  ;;  %v2764_v6 = vunpack.i.h.bf16 %v3715_v60  ;;  %v3785_v60 = vld [vmem:[%s3928_s4] sm:$0xff]  }
 0x3c7   : > { %v3732_v18 = vpop.permute.xlu0 %2776  ;;  %v3734_v1 = vpop.permute.xlu1 %2791  ;;  %v2077_v20 = vpack.c.bf16 %v1843_v16, %v3605_v54 }
 0x3c8   : > { %v2779_v27 = vunpack.i.h.bf16 %v3732_v18  ;;  %v2778_v33 = vunpack.i.l.bf16 %v3732_v18  ;;  %v2793_v2 = vunpack.i.l.bf16 %v3734_v1 }
 0x3c9   : > { %2108 = vmatprep.subr.bf16.mxu0 %v2077_v20 }
 0x3ca   : > { %v1842_v34 = vsel %vm534_vm4, %v2793_v2, %v2773_v49  ;;  %v1889_v0 = vsel %vm581_vm5, %v2778_v33, %v2779_v27  ;;  %v2769_v49 = vunpack.i.h.bf16 %v3713_v4 }
 0x3cb   : > { %v2076_v29 = vpack.c.bf16 %v1842_v34, %v3602_v46  ;;  %v3748_v54 = vpop.permute.xlu0 %2786  ;;  %v2807_v15 = vpop.permute.xlu1 %2806  ;;  %v2083_v19 = vpack.c.bf16 %v1935_v52, %v1889_v0  ;;  %v2754_v46 = vunpack.i.h.bf16 %v3701_v36  ;;  %v1694_v36 = vsel %vm381_vm1, %v2739_v3, %v2759_v23 }
 0x3cc   : > { %v2789_v38 = vunpack.i.h.bf16 %v3748_v54  ;;  %v2788_v31 = vunpack.i.l.bf16 %v3748_v54  ;;  %v2808_v58 = vunpack.i.l.bf16 %v2807_v15  ;;  %v1786_v34 = vsel %vm475_vm3, %v2749_v32, %v2769_v49 }
 0x3cd   : > { %2109 = vmatpush1.bf16.msra.mxu0 %v2076_v29  ;;  %v1648_v61 = vsel %vm334_vm0, %v2734_v14, %v2754_v46  ;;  %v1740_v0 = vsel %vm428_vm2, %v2744_v37, %v2764_v6  ;;  %v2809_v52 = vunpack.i.h.bf16 %v2807_v15 }
 0x3ce   : > { %2110 = vmatprep.subr.bf16.mxu0 %v2083_v19  ;;  %v1981_v59 = vsel %vm675_vm7, %v2788_v31, %v2789_v38  ;;  %v1980_v62 = vsel %vm675_vm7, %v3675_v25, %v2788_v31  ;;  %v1695_v26 = vsel %vm381_vm1, %v2759_v23, %v2808_v58  ;;  %v2066_v2 = vpack.c.bf16 %v1694_v36, %v1648_v61 }
 0x3cf   : > { %v3752_v39 = vpop.permute.xlu0 %2796  ;;  %v3754_v40 = vpop.permute.xlu1 %2816  ;;  %v2421_v9 = vpack.c.bf16 %v2950_v55, %v1981_v59  ;;  %v2424_v3 = vpack.c.bf16 %v2950_v55, %v1980_v62  ;;  %v1696_v15 = vsel %vm381_vm1, %v2808_v58, %v2809_v52  ;;  %v2794_v36 = vunpack.i.h.bf16 %v3734_v1 }
 0x3d0   : > { %v2798_v41 = vunpack.i.l.bf16 %v3752_v39  ;;  %v2818_v16 = vunpack.i.l.bf16 %v3754_v40  ;;  %v2819_v59 = vunpack.i.h.bf16 %v3754_v40 }
 0x3d2   : > { %v1888_v45 = vsel %vm581_vm5, %v2798_v41, %v2778_v33  ;;  %v1787_v19 = vsel %vm475_vm3, %v2769_v49, %v2818_v16  ;;  %v1788_v58 = vsel %vm475_vm3, %v2818_v16, %v2819_v59  ;;  %v1844_v49 = vsel %vm534_vm4, %v2774_v8, %v2794_v36 }
 0x3d3   : > { %v2082_v35 = vpack.c.bf16 %v1934_v56, %v1888_v45  ;;  %v2802_v53 = vpop.permute.xlu0 %2801  ;;  %v1691_v10 = vpop.permute.xlu1 %1690  ;;  %v2799_v8 = vunpack.i.h.bf16 %v3752_v39 }
 0x3d4   : > { %v2803_v63 = vunpack.i.l.bf16 %v2802_v53  ;;  %v2804_v20 = vunpack.i.h.bf16 %v2802_v53  ;;  %v1697_v24 = vsel %vm381_vm1, %v2809_v52, %v1691_v10 }
 0x3d5   : > { %2111 = vmatpush1.bf16.msra.mxu0 %v2082_v35 }
 0x3d6   : > { %2422 = vmatprep.subr.msk.bf16.mxu0 %vm3221_vm10, %v2421_v9  ;;  %v1649_v25 = vsel %vm334_vm0, %v2754_v46, %v2803_v63  ;;  %v1650_v31 = vsel %vm334_vm0, %v2803_v63, %v2804_v20  ;;  %v2072_v46 = vpack.c.bf16 %v1786_v34, %v1740_v0 }
 0x3d7   : > { %v2812_v51 = vpop.permute.xlu0 %2811  ;;  %v1783_v33 = vpop.permute.xlu1 %1782  ;;  %v2067_v14 = vpack.c.bf16 %v1695_v26, %v1649_v25  ;;  %v2068_v45 = vpack.c.bf16 %v1696_v15, %v1650_v31 }
 0x3d8   : > { %v2813_v4 = vunpack.i.l.bf16 %v2812_v51  ;;  %v2814_v41 = vunpack.i.h.bf16 %v2812_v51  ;;  %v1789_v10 = vsel %vm475_vm3, %v2819_v59, %v1783_v33 }
 0x3d9   : > { %2425 = vmatpush1.bf16.msk.msra.mxu0 %vm3221_vm10, %v2424_v3  ;;  %2147 = vmatprep.subr.bf16.mxu1 %v2067_v14 }
 0x3da   : > { %2148 = vmatpush1.bf16.msra.mxu1 %v2066_v2  ;;  %v1741_v29 = vsel %vm428_vm2, %v2764_v6, %v2813_v4  ;;  %v1742_v35 = vsel %vm428_vm2, %v2813_v4, %v2814_v41  ;;  %v2078_v2 = vpack.c.bf16 %v1844_v49, %v3618_v44 }
 0x3db   : > { %v1645_v5 = vpop.permute.xlu0 %1644  ;;  %v2822_v23 = vpop.permute.xlu1 %2821  ;;  %v2073_v32 = vpack.c.bf16 %v1787_v19, %v1741_v29  ;;  %v2074_v40 = vpack.c.bf16 %v1788_v58, %v1742_v35 }
 0x3dc   : > { %v1651_v37 = vsel %vm334_vm0, %v2804_v20, %v1645_v5  ;;  %2378 = vmatmul.mubr.msk.bf16.vlgmr.msra.gmra.mrb[12].mxu0 %vm791_vm11, %v3785_v60  ;;  %v2824_v25 = vunpack.i.h.bf16 %v2822_v23  ;;  %v2823_v26 = vunpack.i.l.bf16 %v2822_v23 }
 0x3dd   : > { %v2069_v56 = vpack.c.bf16 %v1697_v24, %v1651_v37  ;;  %2149 = vmatprep.subr.bf16.mxu1 %v2073_v32  ;;  %2222 = vmatprep.mubr.bf16.mxu0 %v2946_v12 }
 0x3de   : > { %2150 = vmatpush1.bf16.msra.mxu1 %v2072_v46  ;;  %v1936_v44 = vsel %vm628_vm6, %v2784_v13, %v2823_v26  ;;  %v1890_v13 = vsel %vm581_vm5, %v2779_v27, %v2799_v8 }
 0x3df   : > { %v1737_v53 = vpop.permute.xlu0 %1736  ;;  %2190 = vmatprep.subr.bf16.mxu0 %v2069_v56  ;;  %v2842_v9 = vpop.permute.xlu1 %2841  ;;  %v2084_v24 = vpack.c.bf16 %v1936_v44, %v1890_v13 }
 0x3e0   : > { %v1743_v62 = vsel %vm428_vm2, %v2814_v41, %v1737_v53  ;;  %2191 = vmatpush1.bf16.msra.mxu0 %v2068_v45  ;;  %v2844_v51 = vunpack.i.h.bf16 %v2842_v9  ;;  %v2843_v33 = vunpack.i.l.bf16 %v2842_v9  ;;  %v1937_v41 = vsel %vm628_vm6, %v2823_v26, %v2824_v25 }
 0x3e1   : > { %v2075_v63 = vpack.c.bf16 %v1789_v10, %v1743_v62 }
 0x3e2   : > { %v1938_v5 = vsel %vm628_vm6, %v2824_v25, %v2843_v33 }
 0x3e3   : > { %v1887_v61 = vpop.permute.xlu0 %1886  ;;  %2192 = vmatprep.subr.bf16.mxu0 %v2075_v63  ;;  %v2847_v12 = vpop.permute.xlu1 %2846 }
 0x3e4   : > { %2193 = vmatpush1.bf16.msra.mxu0 %v2074_v40  ;;  %v2849_v16 = vunpack.i.h.bf16 %v2847_v12  ;;  %v2848_v14 = vunpack.i.l.bf16 %v2847_v12 }
 0x3e7   : > { %v2827_v6 = vpop.permute.xlu0 %2826 }
 0x3e8   : > { %v2829_v3 = vunpack.i.h.bf16 %v2827_v6  ;;  %v2828_v20 = vunpack.i.l.bf16 %v2827_v6 }
 0x3ea   : > { %v1846_v1 = vsel %vm534_vm4, %v2828_v20, %v2829_v3  ;;  %v1845_v4 = vsel %vm534_vm4, %v2794_v36, %v2828_v20  ;;  %v1847_v48 = vsel %vm534_vm4, %v2829_v3, %v3671_v57  ;;  %v1985_v57 = vsel %vm675_vm7, %v2848_v14, %v2849_v16 }
 0x3eb   : > { %v2080_v34 = vpack.c.bf16 %v1846_v1, %v3634_v11  ;;  %v2832_v0 = vpop.permute.xlu0 %2831  ;;  %v2079_v52 = vpack.c.bf16 %v1845_v4, %v3627_v7  ;;  %v2081_v29 = vpack.c.bf16 %v1847_v48, %v3647_v43  ;;  %v1939_v11 = vsel %vm628_vm6, %v2843_v33, %v2844_v51 }
 0x3ec   : > { %v2834_v19 = vunpack.i.h.bf16 %v2832_v0  ;;  %v2833_v31 = vunpack.i.l.bf16 %v2832_v0  ;;  %v2433_v59 = vpack.c.bf16 %v2950_v55, %v1985_v57 }
 0x3ed   : > { %2151 = vmatprep.subr.bf16.mxu1 %v2079_v52  ;;  %2194 = vmatprep.subr.bf16.mxu0 %v2081_v29 }
 0x3ee   : > { %v1892_v7 = vsel %vm581_vm5, %v2833_v31, %v2834_v19  ;;  %2152 = vmatpush1.bf16.msra.mxu1 %v2078_v2  ;;  %2195 = vmatpush1.bf16.msra.mxu0 %v2080_v34  ;;  %v1891_v43 = vsel %vm581_vm5, %v2799_v8, %v2833_v31  ;;  %v1893_v47 = vsel %vm581_vm5, %v2834_v19, %v1887_v61 }
 0x3ef   : > { %v2086_v39 = vpack.c.bf16 %v1938_v5, %v1892_v7  ;;  %v2837_v23 = vpop.permute.xlu0 %2836  ;;  %v2085_v32 = vpack.c.bf16 %v1937_v41, %v1891_v43  ;;  %v2087_v46 = vpack.c.bf16 %v1939_v11, %v1893_v47 }
 0x3f0   : > { %v2839_v37 = vunpack.i.h.bf16 %v2837_v23  ;;  %v2838_v15 = vunpack.i.l.bf16 %v2837_v23  ;;  %v2274_v23 = vld [vmem:[%s3929_s5 + $0x8] sm:$0xff] }
 0x3f1   : > { %2153 = vmatprep.subr.bf16.mxu1 %v2085_v32  ;;  %2196 = vmatprep.subr.bf16.mxu0 %v2087_v46 }
 0x3f2   : > { %v1982_v56 = vsel %vm675_vm7, %v2789_v38, %v2838_v15  ;;  %v1983_v45 = vsel %vm675_vm7, %v2838_v15, %v2839_v37  ;;  %v1984_v18 = vsel %vm675_vm7, %v2839_v37, %v2848_v14  ;;  %2154 = vmatpush1.bf16.msra.mxu1 %v2084_v24  ;;  %2197 = vmatpush1.bf16.msra.mxu0 %v2086_v39 }
 0x3f3   : > { %v2427_v27 = vpack.c.bf16 %v2950_v55, %v1983_v45  ;;  %v2430_v35 = vpack.c.bf16 %v2950_v55, %v1982_v56  ;;  %v2436_v53 = vpack.c.bf16 %v2950_v55, %v1984_v18  ;;  %2434 = vmatprep.subr.msk.bf16.mxu0 %vm3221_vm10, %v2433_v59 }
 0x3f5   : > { %2428 = vmatprep.subr.msk.bf16.mxu1 %vm3221_vm10, %v2427_v27 }
 0x3f6   : > { %2431 = vmatpush1.bf16.msk.msra.mxu1 %vm3221_vm10, %v2430_v35  ;;  %2437 = vmatpush1.bf16.msk.msra.mxu0 %vm3221_vm10, %v2436_v53  ;;  %v2287_v35 = vld [vmem:[%s3930_s6] sm:$0x1] }
 0x3f9   : > { %2379 = vmatmul.mubr.msk.bf16.vlgmr.msra.gmra.mrb[12].mxu1 %vm791_vm11, %v3785_v60  ;;  %2380 = vmatmul.mubr.msk.bf16.vlgmr.msra.gmra.mrb[16].mxu0 %vm791_vm11, %v3785_v60 }
 0x4af   : > { %v2138_v54 = vpop.f32.mrb[12].mxu0 }
 0x4b0   : > { %v2233_v55 = vmax.f32 %v2138_v54, 0.0  ;;  %v2140_v38 = vpop.f32.mrb[13].mxu0 }
 0x4b1   : > { %v2234_v10 = vmax.f32 %v2140_v38, 0.0  ;;  %v2142_v62 = vpop.f32.mrb[14].mxu0 }
 0x4b2   : > { %v2245_v9 = vmul.f32 %v2233_v55, %v3317_v21  ;;  %v2239_v58 = vmax.f32 %v2142_v62, 0.0  ;;  %v2144_v63 = vpop.f32.mrb[15].mxu0 }
 0x4b3   : > { %v2246_v40 = vmul.f32 %v2234_v10, %v3319_v22  ;;  %v2240_v36 = vmax.f32 %v2144_v63, 0.0 }
 0x4b4   : > { %v2251_v50 = vmul.f32 %v2239_v58, %v3317_v21 }
 0x4b5   : > { %v2257_v61 = vadd.f32 %v2246_v40, %v2245_v9  ;;  %v2252_v12 = vmul.f32 %v2240_v36, %v3319_v22 }
 0x4b7   : > { %v2264_v49 = vadd.f32 %v2252_v12, %v2251_v50 }
 0x4cc   : > { %v2181_v6 = vpop.f32.mrb[12].mxu1  ;;  %v2224_v60 = vpop.f32.mrb[16].mxu0 }
 0x4cd   : > { %v2235_v25 = vmax.f32 %v2181_v6, 0.0  ;;  %v2183_v26 = vpop.f32.mrb[13].mxu1  ;;  %v2237_v3 = vmax.f32 %v2224_v60, 0.0  ;;  %v2226_v20 = vpop.f32.mrb[17].mxu0 }
 0x4ce   : > { %v2236_v51 = vmax.f32 %v2183_v26, 0.0  ;;  %v2185_v33 = vpop.f32.mrb[14].mxu1  ;;  %v2228_v16 = vpop.f32.mrb[18].mxu0  ;;  %v2238_v48 = vmax.f32 %v2226_v20, 0.0 }
 0x4cf   : > { %v2247_v14 = vmul.f32 %v2235_v25, %v3310_v17  ;;  %v2241_v2 = vmax.f32 %v2185_v33, 0.0  ;;  %v2187_v1 = vpop.f32.mrb[15].mxu1  ;;  %v2230_v4 = vpop.f32.mrb[19].mxu0  ;;  %v2249_v34 = vmul.f32 %v2237_v3, %v3352_v42  ;;  %v2243_v52 = vmax.f32 %v2228_v16, 0.0 }
 0x4d0   : > { %v2248_v21 = vmul.f32 %v2236_v51, %v3336_v28  ;;  %v2242_v8 = vmax.f32 %v2187_v1, 0.0  ;;  %v2244_v31 = vmax.f32 %v2230_v4, 0.0  ;;  %v2250_v41 = vmul.f32 %v2238_v48, %v3371_v30 }
 0x4d1   : > { %v2258_v22 = vadd.f32 %v2257_v61, %v2247_v14  ;;  %v2253_v0 = vmul.f32 %v2241_v2, %v3310_v17  ;;  %v2255_v57 = vmul.f32 %v2243_v52, %v3352_v42  ;;  %v2273_v17 = vld [vmem:[%s3929_s5] sm:$0xff] }
 0x4d2   : > { %v2254_v29 = vmul.f32 %v2242_v8, %v3336_v28  ;;  %v2256_v7 = vmul.f32 %v2244_v31, %v3371_v30 }
 0x4d3   : > { %v2259_v44 = vadd.f32 %v2258_v22, %v2248_v21  ;;  %v2265_v19 = vadd.f32 %v2264_v49, %v2253_v0 }
 0x4d5   : > { %v2266_v5 = vadd.f32 %v2265_v19, %v2254_v29  ;;  %v2260_v11 = vadd.f32 %v2259_v44, %v2249_v34 }
 0x4d7   : > { %v2261_v43 = vadd.f32 %v2260_v11, %v2250_v41  ;;  %v2267_v47 = vadd.f32 %v2266_v5, %v2255_v57 }
 0x4d9   : > { %2262 = vadd.xlane.f32.xlu0 %v2261_v43  ;;  %v2268_v13 = vadd.f32 %v2267_v47, %v2256_v7 }
 0x4db   : > { %2269 = vadd.xlane.f32.xlu1 %v2268_v13 }
 0x566   : > { %v2263_v28 = vpop.xlane.xlu0 %2262 }
 0x567   : > { %v2271_v39 = vmul.f32 0.001953125, %v2263_v28 }
 0x568   : > { %v2270_v42 = vpop.xlane.xlu1 %2269 }
 0x569   : > { %v2275_v32 = vmul.f32 %v2273_v17, %v2271_v39  ;;  %v2272_v30 = vmul.f32 0.001953125, %v2270_v42 }
 0x56b   : > { %v2276_v46 = vmul.f32 %v2274_v23, %v2272_v30  ;;  %v2278_v24 = vsel %vm2277_vm12, %v2275_v32, 0.0 }
 0x56d   : > { %v2279_v37 = vsel %vm2277_vm12, %v2276_v46, 0.0 }
 0x56e   : > { %v2280_v15 = vadd.f32 %v2279_v37, %v2278_v24 }
 0x570   : > { %v2281_v59 = vrot.slane %v2280_v15, 4 }
 0x572   : > { %v2282_v56 = vadd.f32 %v2281_v59, %v2280_v15 }
 0x574   : > { %v2283_v45 = vrot.slane %v2282_v56, 2 }
 0x576   : > { %v2284_v18 = vadd.f32 %v2283_v45, %v2282_v56 }
 0x578   : > { %v2285_v27 = vrot.slane %v2284_v18, 1 }
 0x57a   : > { %v2286_v53 = vadd.f32 %v2285_v27, %v2284_v18 }
 0x57c   : > { %v2288_v54 = vadd.f32 %v2287_v35, %v2286_v53 }
 0x57e   : > { %2290 = vst.msk [vmem:[%s270_s14] sm:$0x1] %vm2289_vm13, %v2288_v54 }
 0x57f   : > { %2888 = shalt.err (!%p2885_p3)
}
 0x580   : > { %s2889_s23 = scalar_lea.hbm %s3882_s18, 16  ;;  %s2893_s9 = scalar_lea.hbm %s3931_s7, 32 }
 0x581   : > { %p2890_p4 = scmp.ne.s32.totalorder %s3882_s18, %s2889_s23  ;;  %p2894_p9 = scmp.lt.u32.totalorder %s3882_s18, %s3931_s7 }
 0x582   : > { %p2895_p10 = scmp.lt.u32.totalorder %s2893_s9, %s2889_s23  ;;  %p2897_p12 = scmp.lt.u32.totalorder %s2889_s23, %s3882_s18 }
 0x583   : > { %p2891_p7 = pnand %p2890_p4, %p3030_p5 }
 0x584   : > { %p2896_p11 = por %p2895_p10, %p2894_p9 }
 0x585   : > { %p2892_p8 = pneg %p2891_p7 }
 0x586   : > { %p2898_p13 = por %p2897_p12, %p2896_p11 }
 0x588   : > { %p2899_p0 = pnand %p2898_p13, %p2892_p8 }
 0x58a   : > { %2902 = shalt.err (!%p2899_p0)
}
 0x58b   : > { %2439 = dma.vmem_to_hbm [thread:$0]  (%p3030_p5), %s3884_s15, 16, %s3882_s18, %s2292_s19  }
 0x58c PF: > { %p2445_p1 = scmp.ge.s32.totalorder %s2937_s27, 2  ;;  %s2316_s16 = sand.u32 1, %s2925_s24  }
 0x58d   : > { %s2317_s17 = scalar_lea.sflag [#allocation5], %s2316_s16 }
 0x58e   : > { %p2442_p2 = pnand %p2445_p1, %p3034_p6 }
 0x590   : > { %2920 = dma.done.wait (!%p2442_p2), %s2317_s17, 16  }
 0x591   : > { %2922 = vsyncadd (!%p2442_p2), %s2317_s17, 4294967280  ;;  %p17_p3 = scmp.ge.s32.totalorder %s3017_s30, 4   ;;  %s3936_s24 = smov %s2929_s25 }
 0x592   : > { %s3937_s25 = smov %s2933_s26  ;;  %s3938_s26 = smov %s3028_s10 }
 0x593   : > { %s3939_s27 = smov %s3017_s30  ;;  %19 = sbr.rel (!%p17_p3) target bundleno = 3 (0x3), region = 83 }
 0x59a   :  { %2321 = vsyncpa [#allocation5], 1 }
 0x59b   :  { %2323 = vsyncpa [#allocation5 + $0x1], 1 }

</bundles_post_ra>
